<compile_context>
chip_gen: v7x
topology: tpu7x:2x2x1
jax: 0.10.0
libtpu: 0.0.40
codegen_flags: <defaults>
</compile_context>

<pallas_src>
import jax
import jax.numpy as jnp
from jax.experimental import pallas as pl
from jax.experimental.pallas import tpu as pltpu


def _round_up(n, m):
    return ((n + m - 1) // m) * m


# ---------------- Pallas kernel: fused MLP forward ----------------
def _mlp_kernel(x_ref, w1_ref, b1_ref, w2_ref, b2_ref, o_ref):
    # x:  (TM, D_in) bf16   w1: (D_in, H) bf16   b1: (1, H) f32
    # w2: (H, D_out) bf16   b2: (1, D_out) f32   o:  (TM, D_out)
    # First matmul: bf16 operands, f32 accumulation on the MXU.
    h = jnp.dot(x_ref[...], w1_ref[...], preferred_element_type=jnp.float32)
    # Bias + ReLU on the f32 accumulator (keeps elementwise work in f32 on the
    # VPU -- v5e has no bf16 VALU -- and avoids extra cast traffic).
    h = jnp.maximum(h + b1_ref[...], 0.0)
    # Deliberate bf16 downcast of the hidden activation: feeds the MXU at
    # native width for the second matmul and halves live vreg/VMEM bytes.
    o = jnp.dot(h.astype(jnp.bfloat16), w2_ref[...],
                preferred_element_type=jnp.float32)
    o = o + b2_ref[...]
    o_ref[...] = o.astype(o_ref.dtype)


def mlp_forward(x, w1, b1, w2, b2, *, tm=128, out_dtype=None):
    B, D_in = x.shape
    H = w1.shape[1]
    D_out = w2.shape[1]
    out_dtype = out_dtype or x.dtype

    # MXU-native operand dtypes: bf16 inputs/weights; biases stay f32 so they
    # add directly onto the f32 accumulator.
    xb = x.astype(jnp.bfloat16)
    w1b = w1.astype(jnp.bfloat16)
    w2b = w2.astype(jnp.bfloat16)
    b1f = jnp.asarray(b1, jnp.float32).reshape(1, H)
    b2f = jnp.asarray(b2, jnp.float32).reshape(1, D_out)

    # Batch tile: multiple of 8 sublanes, no larger than the (padded) batch.
    tm = max(8, min(_round_up(tm, 8), _round_up(B, 8)))
    pad = (-B) % tm
    if pad:
        xb = jnp.pad(xb, ((0, pad), (0, 0)))
    Bp = B + pad
    grid = (Bp // tm,)

    flops = 2 * Bp * (D_in * H + H * D_out)
    bytes_accessed = (
        xb.size * 2 + w1b.size * 2 + w2b.size * 2
        + b1f.size * 4 + b2f.size * 4
        + Bp * D_out * jnp.dtype(out_dtype).itemsize)

    def _call(weight_mode):
        extra = {} if weight_mode is None else {"pipeline_mode": weight_mode}
        return pl.pallas_call(
            _mlp_kernel,
            out_shape=jax.ShapeDtypeStruct((Bp, D_out), out_dtype),
            grid=grid,
            in_specs=[
                # Activation tile: pipelined (double-buffered) over the batch grid.
                pl.BlockSpec((tm, D_in), lambda i: (i, 0)),
                # Grid-invariant weights/biases: VMEM-resident across the grid.
                pl.BlockSpec((D_in, H), lambda i: (0, 0), **extra),
                pl.BlockSpec((1, H), lambda i: (0, 0), **extra),
                pl.BlockSpec((H, D_out), lambda i: (0, 0), **extra),
                pl.BlockSpec((1, D_out), lambda i: (0, 0), **extra),
            ],
            out_specs=pl.BlockSpec((tm, D_out), lambda i: (i, 0)),
            compiler_params=pltpu.CompilerParams(
                # Independent batch tiles -> shard across TCs (v7x megacore).
                dimension_semantics=("parallel",),
                # Raise scoped VMEM above the ~32 MiB default for larger tiles.
                vmem_limit_bytes=64 * 1024 * 1024,
            ),
            cost_estimate=pl.CostEstimate(
                flops=flops, transcendentals=0, bytes_accessed=bytes_accessed),
        )(xb, w1b, b1f, w2b, b2f)

    try:
        # Single-buffer the grid-invariant operands (halves their VMEM
        # footprint; the scarce resource on v7x's 64 MiB VMEM).
        out = jax.block_until_ready(_call(pl.Buffered(1)))
    except Exception:
        # Fallback for Pallas versions that reject single-buffering hints.
        out = _call(None)

    if pad:
        out = out[:B]
    return out


# ---------------- FSDP analog (pass-through wrapper) ----------------
class FSDPPallas:
    """Mirrors the PyTorch FSDP wrapper: tags params (metadata only) and
    forwards straight through to the wrapped module's forward."""

    def __init__(self, params, pg=None):
        self.params = params
        # TODO(synk): DTensor ONDEMAND tagging / ProcessGroup sharding is
        # distributed-runtime metadata with no single-kernel equivalent.
        self._dtags = [{"dttype": "ONDEMAND", "pg": pg} for _ in params]

    def __call__(self, x):
        w1, b1, w2, b2 = self.params
        return mlp_forward(x, w1, b1, w2, b2)


if __name__ == "__main__":
    # Small but tile-friendly shapes: 2 batch tiles of 128 rows, 256-wide features.
    B, D_IN, H, D_OUT = 256, 256, 256, 256

    key = jax.random.PRNGKey(0)
    kx, kw1, kb1, kw2, kb2 = jax.random.split(key, 5)

    x = jax.random.normal(kx, (B, D_IN), dtype=jnp.float32)
    # Deterministic parameter init (PyTorch Linear-ish scaling).
    w1 = jax.random.normal(kw1, (D_IN, H), dtype=jnp.float32) / jnp.sqrt(D_IN)
    b1 = jax.random.normal(kb1, (1, H), dtype=jnp.float32) * 0.01
    w2 = jax.random.normal(kw2, (H, D_OUT), dtype=jnp.float32) / jnp.sqrt(H)
    b2 = jax.random.normal(kb2, (1, D_OUT), dtype=jnp.float32) * 0.01

    model = FSDPPallas([w1, b1, w2, b2], pg=None)
    out = jax.block_until_ready(model(x))

    # Reference: same bf16-operand / f32-accumulate numerics in plain JAX.
    xb, w1b, w2b = (t.astype(jnp.bfloat16) for t in (x, w1, w2))
    h_ref = jnp.maximum(
        jnp.dot(xb, w1b, preferred_element_type=jnp.float32) + b1, 0.0)
    ref = jnp.dot(h_ref.astype(jnp.bfloat16), w2b,
                  preferred_element_type=jnp.float32) + b2

    assert out.shape == (B, D_OUT)
    assert out.dtype == x.dtype
    assert jnp.allclose(out, ref, atol=2e-2, rtol=2e-2), float(
        jnp.max(jnp.abs(out - ref)))

    print("KERNEL_OK")
</pallas_src>

<mosaic_0001>
module attributes {stable_mosaic.version = 11 : i64} {
  func.func @_mlp_kernel(%arg0: i32, %arg1: memref<128x256xbf16, #tpu.memory_space<vmem>>, %arg2: memref<256x256xbf16, #tpu.memory_space<vmem>>, %arg3: memref<1x256xf32, #tpu.memory_space<vmem>>, %arg4: memref<256x256xbf16, #tpu.memory_space<vmem>>, %arg5: memref<1x256xf32, #tpu.memory_space<vmem>>, %arg6: memref<128x256xf32, #tpu.memory_space<vmem>>) attributes {dimension_semantics = [#tpu.dimension_semantics<parallel>], iteration_bounds = array<i64: 2>, scalar_prefetch = 0 : i64, scratch_operands = 0 : i64, tpu.core_type = #tpu.core_type<tc>, window_params = [{transform_indices = @transform_0, window_bounds = array<i64: 128, 256>}, {pipeline_mode = #tpu.pipeline_mode<synchronous>, transform_indices = @transform_1, window_bounds = array<i64: 256, 256>}, {pipeline_mode = #tpu.pipeline_mode<synchronous>, transform_indices = @transform_2, window_bounds = array<i64: 1, 256>}, {pipeline_mode = #tpu.pipeline_mode<synchronous>, transform_indices = @transform_3, window_bounds = array<i64: 256, 256>}, {pipeline_mode = #tpu.pipeline_mode<synchronous>, transform_indices = @transform_4, window_bounds = array<i64: 1, 256>}, {transform_indices = @transform_5, window_bounds = array<i64: 128, 256>}]} {
    %c0 = arith.constant 0 : index
    %c0_0 = arith.constant 0 : index
    %0 = vector.load %arg1[%c0, %c0_0] : memref<128x256xbf16, #tpu.memory_space<vmem>>, vector<128x256xbf16>
    %c0_1 = arith.constant 0 : index
    %c0_2 = arith.constant 0 : index
    %1 = vector.load %arg2[%c0_1, %c0_2] : memref<256x256xbf16, #tpu.memory_space<vmem>>, vector<256x256xbf16>
    %cst = arith.constant dense<0.000000e+00> : vector<128x256xf32>
    %2 = tpu.matmul %0, %1, %cst {dimension_numbers = #tpu.dot_dimension_numbers<[1], [0], [0], [1], [0, 0, 1, 1], [], []>} : vector<128x256xbf16>, vector<256x256xbf16>, vector<128x256xf32> -> vector<128x256xf32>
    %c0_3 = arith.constant 0 : index
    %c0_4 = arith.constant 0 : index
    %3 = vector.load %arg3[%c0_3, %c0_4] : memref<1x256xf32, #tpu.memory_space<vmem>>, vector<1x256xf32>
    %4 = vector.broadcast %3 : vector<1x256xf32> to vector<128x256xf32>
    %5 = arith.addf %2, %4 : vector<128x256xf32>
    %cst_5 = arith.constant 0.000000e+00 : f32
    %6 = vector.broadcast %cst_5 : f32 to vector<128x256xf32>
    %7 = arith.maximumf %5, %6 : vector<128x256xf32>
    %8 = arith.truncf %7 : vector<128x256xf32> to vector<128x256xbf16>
    %c0_6 = arith.constant 0 : index
    %c0_7 = arith.constant 0 : index
    %9 = vector.load %arg4[%c0_6, %c0_7] : memref<256x256xbf16, #tpu.memory_space<vmem>>, vector<256x256xbf16>
    %cst_8 = arith.constant dense<0.000000e+00> : vector<128x256xf32>
    %10 = tpu.matmul %8, %9, %cst_8 {dimension_numbers = #tpu.dot_dimension_numbers<[1], [0], [0], [1], [0, 0, 1, 1], [], []>} : vector<128x256xbf16>, vector<256x256xbf16>, vector<128x256xf32> -> vector<128x256xf32>
    %c0_9 = arith.constant 0 : index
    %c0_10 = arith.constant 0 : index
    %11 = vector.load %arg5[%c0_9, %c0_10] : memref<1x256xf32, #tpu.memory_space<vmem>>, vector<1x256xf32>
    %12 = vector.broadcast %11 : vector<1x256xf32> to vector<128x256xf32>
    %13 = arith.addf %10, %12 : vector<128x256xf32>
    %c0_11 = arith.constant 0 : index
    %c0_12 = arith.constant 0 : index
    %14 = vector.load %arg6[%c0_11, %c0_12] : memref<128x256xf32, #tpu.memory_space<vmem>>, vector<128x256xf32>
    tpu.vector_store %arg6[%c0_11, %c0_12], %13 {strides = array<i32>} : memref<128x256xf32, #tpu.memory_space<vmem>>, vector<128x256xf32>,
    return
  }
  func.func @transform_0(%arg0: i32) -> (i32, i32) {
    %c0_i32 = arith.constant 0 : i32
    %c0_i32_0 = arith.constant 0 : i32
    return %arg0, %c0_i32 : i32, i32
  }
  func.func @transform_1(%arg0: i32) -> (i32, i32) {
    %c0_i32 = arith.constant 0 : i32
    %c0_i32_0 = arith.constant 0 : i32
    %c0_i32_1 = arith.constant 0 : i32
    return %c0_i32, %c0_i32_0 : i32, i32
  }
  func.func @transform_2(%arg0: i32) -> (i32, i32) {
    %c0_i32 = arith.constant 0 : i32
    %c0_i32_0 = arith.constant 0 : i32
    %c0_i32_1 = arith.constant 0 : i32
    return %c0_i32, %c0_i32_0 : i32, i32
  }
  func.func @transform_3(%arg0: i32) -> (i32, i32) {
    %c0_i32 = arith.constant 0 : i32
    %c0_i32_0 = arith.constant 0 : i32
    %c0_i32_1 = arith.constant 0 : i32
    return %c0_i32, %c0_i32_0 : i32, i32
  }
  func.func @transform_4(%arg0: i32) -> (i32, i32) {
    %c0_i32 = arith.constant 0 : i32
    %c0_i32_0 = arith.constant 0 : i32
    %c0_i32_1 = arith.constant 0 : i32
    return %c0_i32, %c0_i32_0 : i32, i32
  }
  func.func @transform_5(%arg0: i32) -> (i32, i32) {
    %c0_i32 = arith.constant 0 : i32
    %c0_i32_0 = arith.constant 0 : i32
    return %arg0, %c0_i32 : i32, i32
  }
}

module attributes {stable_mosaic.version = 11 : i64} {
  func.func @_mlp_kernel(%arg0: i32, %arg1: memref<128x256xbf16, #tpu.memory_space<vmem>>, %arg2: memref<256x256xbf16, #tpu.memory_space<vmem>>, %arg3: memref<1x256xf32, #tpu.memory_space<vmem>>, %arg4: memref<256x256xbf16, #tpu.memory_space<vmem>>, %arg5: memref<1x256xf32, #tpu.memory_space<vmem>>, %arg6: memref<128x256xf32, #tpu.memory_space<vmem>>) attributes {dimension_semantics = [#tpu.dimension_semantics<parallel>], iteration_bounds = array<i64: 2>, scalar_prefetch = 0 : i64, scratch_operands = 0 : i64, tpu.core_type = #tpu.core_type<tc>, window_params = [{transform_indices = @transform_0, window_bounds = array<i64: 128, 256>}, {pipeline_mode = #tpu.pipeline_mode<synchronous>, transform_indices = @transform_1, window_bounds = array<i64: 256, 256>}, {pipeline_mode = #tpu.pipeline_mode<synchronous>, transform_indices = @transform_2, window_bounds = array<i64: 1, 256>}, {pipeline_mode = #tpu.pipeline_mode<synchronous>, transform_indices = @transform_3, window_bounds = array<i64: 256, 256>}, {pipeline_mode = #tpu.pipeline_mode<synchronous>, transform_indices = @transform_4, window_bounds = array<i64: 1, 256>}, {transform_indices = @transform_5, window_bounds = array<i64: 128, 256>}]} {
    %c0 = arith.constant 0 : index
    %c0_0 = arith.constant 0 : index
    %0 = vector.load %arg1[%c0, %c0_0] : memref<128x256xbf16, #tpu.memory_space<vmem>>, vector<128x256xbf16>
    %c0_1 = arith.constant 0 : index
    %c0_2 = arith.constant 0 : index
    %1 = vector.load %arg2[%c0_1, %c0_2] : memref<256x256xbf16, #tpu.memory_space<vmem>>, vector<256x256xbf16>
    %cst = arith.constant dense<0.000000e+00> : vector<128x256xf32>
    %2 = tpu.matmul %0, %1, %cst {dimension_numbers = #tpu.dot_dimension_numbers<[1], [0], [0], [1], [0, 0, 1, 1], [], []>} : vector<128x256xbf16>, vector<256x256xbf16>, vector<128x256xf32> -> vector<128x256xf32>
    %c0_3 = arith.constant 0 : index
    %c0_4 = arith.constant 0 : index
    %3 = vector.load %arg3[%c0_3, %c0_4] : memref<1x256xf32, #tpu.memory_space<vmem>>, vector<1x256xf32>
    %4 = vector.broadcast %3 : vector<1x256xf32> to vector<128x256xf32>
    %5 = arith.addf %2, %4 : vector<128x256xf32>
    %cst_5 = arith.constant 0.000000e+00 : f32
    %6 = vector.broadcast %cst_5 : f32 to vector<128x256xf32>
    %7 = arith.maximumf %5, %6 : vector<128x256xf32>
    %8 = arith.truncf %7 : vector<128x256xf32> to vector<128x256xbf16>
    %c0_6 = arith.constant 0 : index
    %c0_7 = arith.constant 0 : index
    %9 = vector.load %arg4[%c0_6, %c0_7] : memref<256x256xbf16, #tpu.memory_space<vmem>>, vector<256x256xbf16>
    %cst_8 = arith.constant dense<0.000000e+00> : vector<128x256xf32>
    %10 = tpu.matmul %8, %9, %cst_8 {dimension_numbers = #tpu.dot_dimension_numbers<[1], [0], [0], [1], [0, 0, 1, 1], [], []>} : vector<128x256xbf16>, vector<256x256xbf16>, vector<128x256xf32> -> vector<128x256xf32>
    %c0_9 = arith.constant 0 : index
    %c0_10 = arith.constant 0 : index
    %11 = vector.load %arg5[%c0_9, %c0_10] : memref<1x256xf32, #tpu.memory_space<vmem>>, vector<1x256xf32>
    %12 = vector.broadcast %11 : vector<1x256xf32> to vector<128x256xf32>
    %13 = arith.addf %10, %12 : vector<128x256xf32>
    %c0_11 = arith.constant 0 : index
    %c0_12 = arith.constant 0 : index
    %14 = vector.load %arg6[%c0_11, %c0_12] : memref<128x256xf32, #tpu.memory_space<vmem>>, vector<128x256xf32>
    tpu.vector_store %arg6[%c0_11, %c0_12], %13 {strides = array<i32>} : memref<128x256xf32, #tpu.memory_space<vmem>>, vector<128x256xf32>,
    return
  }
  func.func @transform_0(%arg0: i32) -> (i32, i32) {
    %c0_i32 = arith.constant 0 : i32
    %c0_i32_0 = arith.constant 0 : i32
    return %arg0, %c0_i32 : i32, i32
  }
  func.func @transform_1(%arg0: i32) -> (i32, i32) {
    %c0_i32 = arith.constant 0 : i32
    %c0_i32_0 = arith.constant 0 : i32
    %c0_i32_1 = arith.constant 0 : i32
    return %c0_i32, %c0_i32_0 : i32, i32
  }
  func.func @transform_2(%arg0: i32) -> (i32, i32) {
    %c0_i32 = arith.constant 0 : i32
    %c0_i32_0 = arith.constant 0 : i32
    %c0_i32_1 = arith.constant 0 : i32
    return %c0_i32, %c0_i32_0 : i32, i32
  }
  func.func @transform_3(%arg0: i32) -> (i32, i32) {
    %c0_i32 = arith.constant 0 : i32
    %c0_i32_0 = arith.constant 0 : i32
    %c0_i32_1 = arith.constant 0 : i32
    return %c0_i32, %c0_i32_0 : i32, i32
  }
  func.func @transform_4(%arg0: i32) -> (i32, i32) {
    %c0_i32 = arith.constant 0 : i32
    %c0_i32_0 = arith.constant 0 : i32
    %c0_i32_1 = arith.constant 0 : i32
    return %c0_i32, %c0_i32_0 : i32, i32
  }
  func.func @transform_5(%arg0: i32) -> (i32, i32) {
    %c0_i32 = arith.constant 0 : i32
    %c0_i32_0 = arith.constant 0 : i32
    return %arg0, %c0_i32 : i32, i32
  }
}

</mosaic_0001>

<bundles_post_ra>
// kernel: tpu_custom_call.1
= control target key start
LH: loop header
LB: loop body
LE: loop exit
PB: predicated region body
PF: predicated region fallthrough
CT: control target
= control target key end

     0   :  { %10 = vsyncpa [#allocation3], 0  ;;  %s2237_s0 = inlined_call_operand.hbm [shape: bf16[256,256], index: 0, kind: input, shape index: {}]   ;;  %s2238_s1 = inlined_call_operand.hbm [shape: bf16[256,256], index: 1, kind: input, shape index: {}]   ;;  %s2239_s2 = inlined_call_operand.hbm [shape: f32[1,256], index: 2, kind: input, shape index: {}]   ;;  %s2240_s3 = inlined_call_operand.hbm [shape: bf16[256,256], index: 3, kind: input, shape index: {}]   ;;  %s2241_s4 = inlined_call_operand.hbm [shape: f32[1,256], index: 4, kind: input, shape index: {}]   ;;  %s2242_s5 = inlined_call_operand.hbm [shape: f32[256,256], index: 5, kind: output, shape index: {}]  }
   0x1   :  { %12 = vsyncpa [#allocation3 + $0x1], 0 }
   0x2   :  { %13 = vsyncpa [#allocation6], 0 }
   0x3   :  { %14 = vsyncpa [#allocation9], 0 }
   0x4   :  { %15 = vsyncpa [#allocation4], 0 }
   0x5   :  { %17 = vsyncpa [#allocation4 + $0x1], 0  ;;  %s1813_s18 = smov 0   ;;  %s1815_s19 = smov 0  }
   0x6   :  { %s1817_s20 = smov 0   ;;  %s1819_s21 = smov 0  }
   0x7 LB: > { %s1834_s22 = sadd.s32 4294967295, %s1771_s21   ;;  %s1236_s23 = sadd.s32 4294967294, %s1771_s21   ;;  %s1771_s21 = sphi %s1819_s21, %s2265_s21   ;;  %s1767_s20 = sphi %s1817_s20, %s2264_s20   ;;  %s1763_s19 = sphi %s1815_s19, %s2263_s19   ;;  %s1759_s18 = sphi %s1813_s18, %s2262_s18  }
   0x8   : > { %p43_p0 = scmp.ne.s32.totalorder %s1763_s19, %s1759_s18  ;;  %p2243_p1 = scmp.eq.s32.totalorder %s1834_s22, 0 }
   0x9   : > { %p157_p3 = scmp.eq.s32.totalorder %s1236_s23, 1  ;;  %p1237_p5 = scmp.ge.s32.totalorder %s1771_s21, 1 }
   0xa   : > { %p1843_p4 = por %p2243_p1, %p43_p0  ;;  %p164_p7 = scmp.lt.s32.totalorder %s1771_s21, 3 }
   0xb   : > { %p1848_p6 = por %p157_p3, %p43_p0  ;;  %s1773_s27 = smov [#allocation5]  }
   0xc   : > { %s2246_s24 = scalar_select %p1843_p4, 1, 0 }
   0xd   : > { %s2247_s25 = scalar_select %p1848_p6, 1, 0 }
   0xe   : > { %p1853_p8 = pnand %p1237_p5, %p164_p7  ;;  %s176_s28 = sshll.u32 %s1773_s27, 4  ;;  %s1857_s28 = int_to_ptr.vmem [resolvable:$true] %s176_s28 }
   0xf   : > { %s1774_s30 = smov [#allocation8]   ;;  %s1775_s7 = smov [#allocation7]  }
  0x10   : > { %s2248_s26 = scalar_select %p1853_p8, 1, 0 }
  0x11   : > { %p1364_p9 = pneg %p1853_p8  ;;  %s200_s6 = sshll.u32 %s1774_s30, 4  ;;  %s1868_s6 = int_to_ptr.vmem [resolvable:$true] %s200_s6 }
  0x12   : > { %s1870_s8 = sshll.u32 %s1775_s7, 4  ;;  %s1555_s11 = scalar_lea.hbm %s2238_s1, 4096  ;;  %s191_s8 = int_to_ptr.vmem [resolvable:$true] %s1870_s8 }
  0x13   : > { %p1864_p11 = pnand %p1364_p9, %p2243_p1  ;;  %p1556_p12 = scmp.ne.s32.totalorder %s2238_s1, %s1555_s11 }
  0x14   : > { %p1562_p5 = scmp.lt.u32.totalorder %s1555_s11, %s2238_s1 }
  0x15   : > { %p1880_p13 = pneg %p1864_p11 }
  0x17   : > { %p1558_p0 = pnand %p1880_p13, %p1556_p12 }
  0x19   : > { %p1559_p3 = pneg %p1558_p0 }
  0x1b   : > { %p1564_p7 = pnand %p1562_p5, %p1559_p3 }
  0x1d   : > { %1567 = shalt.err (!%p1564_p7)
}
  0x1e   : > { %s1568_s17 = scalar_lea.vmem %s1857_s28, 4096  ;;  %p1576_p2 = scmp.lt.s32.totalorder %s1857_s28, %s1857_s28 }
  0x1f   : > { %p1569_p9 = scmp.ne.s32.totalorder %s1857_s28, %s1568_s17  ;;  %p1577_p6 = scmp.lt.s32.totalorder %s1568_s17, %s1568_s17 }
  0x21   : > { %p1571_p10 = pnand %p1569_p9, %p1880_p13  ;;  %p1578_p12 = por %p1577_p6, %p1576_p2 }
  0x23   : > { %p1572_p1 = pneg %p1571_p10 }
  0x25   : > { %p1579_p0 = pnand %p1578_p12, %p1572_p1 }
  0x27   : > { %1582 = shalt.err (!%p1579_p0)
}
  0x28   : > { %s1776_s23 = smov 128   ;;  %s1777_s27 = smov 8  }
  0x29   : > { %1367 = dma.hbm_to_vmem [thread:$0]  (!%p1864_p11), %s2238_s1, 4096, %s1857_s28, [#allocation6], %s1776_s23, %s1776_s23, %s1777_s27  }
  0x2a   : > { %s1583_s11 = scalar_lea.hbm %s2240_s3, 4096 }
  0x2b   : > { %p1584_p1 = scmp.ne.s32.totalorder %s2240_s3, %s1583_s11  ;;  %p1590_p10 = scmp.lt.u32.totalorder %s1583_s11, %s2240_s3 }
  0x2d   : > { %p1586_p2 = pnand %p1584_p1, %p1880_p13 }
  0x2f   : > { %p1587_p6 = pneg %p1586_p2 }
  0x31   : > { %p1592_p3 = pnand %p1590_p10, %p1587_p6 }
  0x33   : > { %1595 = shalt.err (!%p1592_p3)
}
  0x34   : > { %s1596_s28 = scalar_lea.vmem %s1868_s6, 4096  ;;  %p1604_p12 = scmp.lt.s32.totalorder %s1868_s6, %s1868_s6 }
  0x35   : > { %p1597_p5 = scmp.ne.s32.totalorder %s1868_s6, %s1596_s28  ;;  %p1605_p0 = scmp.lt.s32.totalorder %s1596_s28, %s1596_s28 }
  0x37   : > { %p1599_p7 = pnand %p1597_p5, %p1880_p13  ;;  %p1606_p1 = por %p1605_p0, %p1604_p12 }
  0x39   : > { %p1600_p9 = pneg %p1599_p7 }
  0x3b   : > { %p1607_p2 = pnand %p1606_p1, %p1600_p9 }
  0x3d   : > { %1610 = shalt.err (!%p1607_p2)
}
  0x3e   : > { %1373 = dma.hbm_to_vmem [thread:$0]  (!%p1864_p11), %s2240_s3, 4096, %s1868_s6, [#allocation9], %s1776_s23, %s1776_s23, %s1777_s27  }
  0x3f   : > { %s1611_s10 = scalar_lea.hbm %s2239_s2, 32 }
  0x40   : > { %p1612_p6 = scmp.ne.s32.totalorder %s2239_s2, %s1611_s10  ;;  %p1618_p5 = scmp.lt.u32.totalorder %s1611_s10, %s2239_s2 }
  0x42   : > { %p1614_p10 = pnand %p1612_p6, %p1880_p13 }
  0x44   : > { %p1615_p3 = pneg %p1614_p10 }
  0x46   : > { %p1620_p7 = pnand %p1618_p5, %p1615_p3 }
  0x48   : > { %1623 = shalt.err (!%p1620_p7)
}
  0x49   : > { %s1624_s16 = scalar_lea.vmem %s191_s8, 32  ;;  %p1632_p1 = scmp.lt.s32.totalorder %s191_s8, %s191_s8 }
  0x4a   : > { %p1625_p9 = scmp.ne.s32.totalorder %s191_s8, %s1624_s16  ;;  %p1633_p2 = scmp.lt.s32.totalorder %s1624_s16, %s1624_s16 }
  0x4c   : > { %p1627_p12 = pnand %p1625_p9, %p1880_p13  ;;  %p1634_p4 = por %p1633_p2, %p1632_p1 }
  0x4e   : > { %p1628_p0 = pneg %p1627_p12 }
  0x50   : > { %p1635_p8 = pnand %p1634_p4, %p1628_p0 }
  0x52   : > { %1638 = shalt.err (!%p1635_p8)
}
  0x53   : > { %1370 = dma.hbm_to_vmem [thread:$0]  (!%p1864_p11), %s2239_s2, 32, %s191_s8, [#allocation6]  }
  0x54   : > { %s1778_s17 = smov [#allocation10]   ;;  %s1639_s10 = scalar_lea.hbm %s2241_s4, 32 }
  0x55   : > { %s214_s30 = sshll.u32 %s1778_s17, 4  ;;  %p1640_p6 = scmp.ne.s32.totalorder %s2241_s4, %s1639_s10  ;;  %s215_s30 = int_to_ptr.vmem [resolvable:$true] %s214_s30 }
  0x56   : > { %p1646_p10 = scmp.lt.u32.totalorder %s1639_s10, %s2241_s4 }
  0x57   : > { %p1642_p4 = pnand %p1640_p6, %p1880_p13 }
  0x59   : > { %p1643_p8 = pneg %p1642_p4 }
  0x5b   : > { %p1648_p3 = pnand %p1646_p10, %p1643_p8 }
  0x5d   : > { %1651 = shalt.err (!%p1648_p3)
}
  0x5e   : > { %s1652_s8 = scalar_lea.vmem %s215_s30, 32  ;;  %p1660_p12 = scmp.lt.s32.totalorder %s215_s30, %s215_s30 }
  0x5f   : > { %p1653_p5 = scmp.ne.s32.totalorder %s215_s30, %s1652_s8  ;;  %p1661_p0 = scmp.lt.s32.totalorder %s1652_s8, %s1652_s8 }
  0x61   : > { %p1655_p7 = pnand %p1653_p5, %p1880_p13  ;;  %p1662_p1 = por %p1661_p0, %p1660_p12 }
  0x63   : > { %p1656_p9 = pneg %p1655_p7 }
  0x65   : > { %p1663_p2 = pnand %p1662_p1, %p1656_p9 }
  0x67   : > { %1666 = shalt.err (!%p1663_p2)
}
  0x68   : > { %1376 = dma.hbm_to_vmem [thread:$0]  (!%p1864_p11), %s2241_s4, 32, %s215_s30, [#allocation9]  }
  0x69   : > { %s1968_s14 = sadd.s32 1, %s1771_s21   ;;  %s30_s28 = sadd.s32 1, %s1767_s20 }
  0x6a   : > { %s27_s29 = ssub.s32 %s1771_s21, %s1968_s14  ;;  %p37_p13 = scmp.ne.s32.totalorder %s1767_s20, %s1763_s19 }
  0x6b   : > { %p28_p6 = scmp.eq.s32.totalorder %s27_s29, 0  ;;  %p38_p4 = scmp.eq.s32.totalorder %s1771_s21, 0 }
  0x6c   : > { %p2251_p8 = scmp.eq.s32.totalorder %s1834_s22, 1  ;;  %p1389_p3 = scmp.lt.s32.totalorder %s1771_s21, 2 }
  0x6d   : > { %s1984_s7 = scalar_select %p28_p6, %s1767_s20, %s30_s28  }
  0x6e   : > { %p1978_p10 = por %p2251_p8, %p37_p13  ;;  %p39_p5 = por %p38_p4, %p37_p13 }
  0x6f   : > { %s225_s9 = sand.u32 1, %s1767_s20   ;;  %s1341_s30 = sshll.u32 %s1771_s21, 11 }
  0x70   : > { %s1243_s10 = sshll.u32 %s225_s9, 7  ;;  %s1991_s13 = scalar_lea.hbm %s2237_s0, %s1341_s30 }
  0x71   : > { %s229_s15 = scalar_lea.vmem [#allocation2], %s1243_s10  ;;  %p1995_p11 = pnand %p1389_p3, %p39_p5 }
  0x72   : > { %s237_s8 = sshll.u32 %s229_s15, 4  ;;  %s1999_s6 = scalar_lea.sflag [#allocation3], %s225_s9  ;;  %s1993_s8 = int_to_ptr.vmem [resolvable:$true] %s237_s8 }
  0x73   : > { %s1667_s28 = scalar_lea.hbm %s1991_s13, 2048  ;;  %p1669_p9 = pneg %p1995_p11 }
  0x74   : > { %p1668_p7 = scmp.ne.s32.totalorder %s1991_s13, %s1667_s28  ;;  %s1672_s30 = scalar_lea.hbm %s2237_s0, 4096 }
  0x75   : > { %p1673_p1 = scmp.lt.u32.totalorder %s1991_s13, %s2237_s0  ;;  %p1674_p2 = scmp.lt.u32.totalorder %s1672_s30, %s1667_s28 }
  0x76   : > { %p1670_p12 = pnand %p1669_p9, %p1668_p7  ;;  %p1676_p6 = scmp.lt.u32.totalorder %s1667_s28, %s1991_s13 }
  0x77   : > { %p1675_p13 = por %p1674_p2, %p1673_p1 }
  0x78   : > { %p1671_p0 = pneg %p1670_p12 }
  0x79   : > { %p1677_p4 = por %p1676_p6, %p1675_p13 }
  0x7b   : > { %p1678_p8 = pnand %p1677_p4, %p1671_p0 }
  0x7d   : > { %1681 = shalt.err (!%p1678_p8)
}
  0x7e   : > { %s1682_s9 = scalar_lea.vmem %s1993_s8, 2048  ;;  %s1779_s15 = smov [#allocation2]  }
  0x7f   : > { %p1683_p3 = scmp.ne.s32.totalorder %s1993_s8, %s1682_s9  ;;  %s1687_s29 = sshll.u32 %s1779_s15, 4  ;;  %s1688_s29 = int_to_ptr.vmem [resolvable:$false] %s1687_s29 }
  0x80   : > { %s1689_s10 = scalar_lea.vmem %s1688_s29, 4096  ;;  %p1690_p12 = scmp.lt.s32.totalorder %s1993_s8, %s1688_s29 }
  0x81   : > { %p1685_p5 = pnand %p1683_p3, %p1669_p9  ;;  %p1691_p1 = scmp.lt.s32.totalorder %s1689_s10, %s1682_s9 }
  0x83   : > { %p1686_p7 = pneg %p1685_p5  ;;  %p1692_p2 = por %p1691_p1, %p1690_p12 }
  0x85   : > { %p1693_p13 = pnand %p1692_p2, %p1686_p7 }
  0x87   : > { %1696 = shalt.err (!%p1693_p13)
}
  0x88   : > { %1380 = dma.hbm_to_vmem [thread:$0]  (!%p1995_p11), %s1991_s13, 2048, %s1993_s8, %s1999_s6, %s1776_s23, %s1776_s23, %s1777_s27  }
  0x89   : > { %p2254_p9 = scmp.ne.s32.totalorder %s2248_s26, 0 }
  0x8a   : > { %s2033_s28 = sand.u32 (!%p2254_p9), 1, %s1763_s19   ;;  %p2255_p0 = scmp.ne.s32.totalorder (!%p2254_p9), %s2246_s24, 0 }
  0x8b   : > { %249 = sbr.rel (%p2254_p9) target bundleno = 729 (0x2d9), region = 40  ;;  %s1248_s30 = sshll.u32 (!%p2254_p9), %s2033_s28, 7 }
  0x8c   : > { %s252_s11 = scalar_lea.sflag (!%p2254_p9), [#allocation3], %s2033_s28  ;;  %s2037_s12 = scalar_lea.vmem (!%p2254_p9), [#allocation2], %s1248_s30 }
  0x92   : > { %1742 = dma.done.wait (%p2255_p0), %s252_s11, 2048  }
  0x93   : > { %1744 = vsyncadd (%p2255_p0), %s252_s11, 4294965248  ;;  %p2256_p11 = scmp.eq.s32.totalorder %s1834_s22, 0 }
  0x95   : > { %1746 = dma.done.wait (%p2256_p11), [#allocation6], 4128   ;;  %p2257_p6 = pmov %p2256_p11 }
  0x97   : > { %1748 = vsyncadd (%p2257_p6), [#allocation6], 4294963168  ;;  %p2258_p4 = pmov %p2257_p6 }
  0x99   : > { %1750 = dma.done.wait (%p2258_p4), [#allocation9], 4128   ;;  %p2259_p8 = pmov %p2258_p4 }
  0x9a   : > { %v1435_v0 = vld [vmem:[#allocation5 + $0x4] ss:$8 sps:$4 sm:$0xff]   ;;  %v1437_v1 = vld [vmem:[#allocation5] ss:$8 sps:$4 sm:$0xff]   ;;  %v1438_v2 = vld [vmem:[#allocation5 + $0x14] ss:$8 sps:$4 sm:$0xff]  }
  0x9b   : > { %1752 = vsyncadd (%p2259_p8), [#allocation9], 4294963168  ;;  %600 = vmatprep.subr.bf16.mxu0 %v1435_v0  ;;  %v1440_v3 = vld [vmem:[#allocation5 + $0x10] ss:$8 sps:$4 sm:$0xff]   ;;  %v1441_v4 = vld [vmem:[#allocation5 + $0x24] ss:$8 sps:$4 sm:$0xff]  }
  0x9c   : > { %601 = vmatpush1.bf16.msra.mxu0 %v1437_v1  ;;  %v1443_v5 = vld [vmem:[#allocation5 + $0x20] ss:$8 sps:$4 sm:$0xff]   ;;  %v1444_v6 = vld [vmem:[#allocation5 + $0x34] ss:$8 sps:$4 sm:$0xff]   ;;  %v1446_v7 = vld [vmem:[#allocation5 + $0x30] ss:$8 sps:$4 sm:$0xff]  }
  0x9d   : > { %602 = vmatprep.subr.bf16.mxu0 %v1438_v2  ;;  %v1447_v8 = vld [vmem:[#allocation5 + $0x44] ss:$8 sps:$4 sm:$0xff]   ;;  %v1449_v9 = vld [vmem:[#allocation5 + $0x40] ss:$8 sps:$4 sm:$0xff]   ;;  %v1450_v10 = vld [vmem:[#allocation5 + $0x54] ss:$8 sps:$4 sm:$0xff]  }
  0x9e   : > { %v1452_v11 = vld [vmem:[#allocation5 + $0x50] ss:$8 sps:$4 sm:$0xff]   ;;  %v1453_v12 = vld [vmem:[#allocation5 + $0x64] ss:$8 sps:$4 sm:$0xff]   ;;  %v1455_v14 = vld [vmem:[#allocation5 + $0x60] ss:$8 sps:$4 sm:$0xff]  }
  0x9f   : > { %v1485_v13 = vld [vmem:[%s2037_s12 + $0x4] ss:$8 sps:$4 sm:$0xff]   ;;  %v1456_v15 = vld [vmem:[#allocation5 + $0x74] ss:$8 sps:$4 sm:$0xff]   ;;  %v1458_v16 = vld [vmem:[#allocation5 + $0x70] ss:$8 sps:$4 sm:$0xff]  }
  0xa0   : > { %603 = vmatpush1.bf16.msra.mxu0 %v1440_v3  ;;  %632 = vmatprep.mubr.bf16.mxu0 %v1485_v13  ;;  %v1459_v17 = vld [vmem:[#allocation5 + $0x84] ss:$8 sps:$4 sm:$0xff]   ;;  %v1461_v18 = vld [vmem:[#allocation5 + $0x80] ss:$8 sps:$4 sm:$0xff]   ;;  %v1462_v19 = vld [vmem:[#allocation5 + $0x94] ss:$8 sps:$4 sm:$0xff]  }
  0xa1   : > { %604 = vmatprep.subr.bf16.mxu0 %v1441_v4  ;;  %v1507_v20 = vld [vmem:[#allocation8 + $0x4] ss:$8 sps:$4 sm:$0xff]   ;;  %v1509_v21 = vld [vmem:[#allocation8] ss:$8 sps:$4 sm:$0xff]   ;;  %v1510_v23 = vld [vmem:[#allocation8 + $0x14] ss:$8 sps:$4 sm:$0xff]  }
  0xa2   : > { %v1464_v22 = vld [vmem:[#allocation5 + $0x90] ss:$8 sps:$4 sm:$0xff]   ;;  %965 = vmatprep.subr.bf16.mxu1 %v1507_v20  ;;  %v1465_v24 = vld [vmem:[#allocation5 + $0xa4] ss:$8 sps:$4 sm:$0xff]   ;;  %v1467_v27 = vld [vmem:[#allocation5 + $0xa0] ss:$8 sps:$4 sm:$0xff]  }
  0xa3   : > { %966 = vmatpush1.bf16.msra.mxu1 %v1509_v21  ;;  %v1512_v25 = vld [vmem:[#allocation8 + $0x10] ss:$8 sps:$4 sm:$0xff]   ;;  %v1513_v26 = vld [vmem:[#allocation8 + $0x24] ss:$8 sps:$4 sm:$0xff]   ;;  %v1515_v29 = vld [vmem:[#allocation8 + $0x20] ss:$8 sps:$4 sm:$0xff]  }
  0xa4   : > { %605 = vmatpush1.bf16.msra.mxu0 %v1443_v5  ;;  %967 = vmatprep.subr.bf16.mxu1 %v1510_v23  ;;  %v1468_v28 = vld [vmem:[#allocation5 + $0xb4] ss:$8 sps:$4 sm:$0xff]   ;;  %v1470_v31 = vld [vmem:[#allocation5 + $0xb0] ss:$8 sps:$4 sm:$0xff]   ;;  %v1471_v32 = vld [vmem:[#allocation5 + $0xc4] ss:$8 sps:$4 sm:$0xff]  }
  0xa5   : > { %606 = vmatprep.subr.bf16.mxu0 %v1444_v6  ;;  %v1516_v30 = vld [vmem:[#allocation8 + $0x34] ss:$8 sps:$4 sm:$0xff]   ;;  %v1518_v33 = vld [vmem:[#allocation8 + $0x30] ss:$8 sps:$4 sm:$0xff]   ;;  %v1519_v34 = vld [vmem:[#allocation8 + $0x44] ss:$8 sps:$4 sm:$0xff]  }
  0xa6   : > { %v1473_v35 = vld [vmem:[#allocation5 + $0xc0] ss:$8 sps:$4 sm:$0xff]   ;;  %v1474_v36 = vld [vmem:[#allocation5 + $0xd4] ss:$8 sps:$4 sm:$0xff]   ;;  %v1476_v39 = vld [vmem:[#allocation5 + $0xd0] ss:$8 sps:$4 sm:$0xff]  }
  0xa7   : > { %968 = vmatpush1.bf16.msra.mxu1 %v1512_v25  ;;  %v1521_v37 = vld [vmem:[#allocation8 + $0x40] ss:$8 sps:$4 sm:$0xff]   ;;  %v1522_v38 = vld [vmem:[#allocation8 + $0x54] ss:$8 sps:$4 sm:$0xff]   ;;  %v1524_v40 = vld [vmem:[#allocation8 + $0x50] ss:$8 sps:$4 sm:$0xff]  }
  0xa8   : > { %607 = vmatpush1.bf16.msra.mxu0 %v1446_v7  ;;  %969 = vmatprep.subr.bf16.mxu1 %v1513_v26  ;;  %v1477_v41 = vld [vmem:[#allocation5 + $0xe4] ss:$8 sps:$4 sm:$0xff]   ;;  %v1479_v43 = vld [vmem:[#allocation5 + $0xe0] ss:$8 sps:$4 sm:$0xff]   ;;  %v1480_v45 = vld [vmem:[#allocation5 + $0xf4] ss:$8 sps:$4 sm:$0xff]  }
  0xa9   : > { %608 = vmatprep.subr.bf16.mxu0 %v1447_v8  ;;  %v1525_v42 = vld [vmem:[#allocation8 + $0x64] ss:$8 sps:$4 sm:$0xff]   ;;  %v1527_v44 = vld [vmem:[#allocation8 + $0x60] ss:$8 sps:$4 sm:$0xff]   ;;  %v1528_v46 = vld [vmem:[#allocation8 + $0x74] ss:$8 sps:$4 sm:$0xff]  }
  0xaa   : > { %v1482_v47 = vld [vmem:[#allocation5 + $0xf0] ss:$8 sps:$4 sm:$0xff]   ;;  %v1483_v50 = vld [vmem:[%s2037_s12] ss:$8 sps:$4 sm:$0xff]   ;;  %v1486_v51 = vld [vmem:[%s2037_s12 + $0x14] ss:$8 sps:$4 sm:$0xff]  }
  0xab   : > { %970 = vmatpush1.bf16.msra.mxu1 %v1515_v29  ;;  %v1530_v48 = vld [vmem:[#allocation8 + $0x70] ss:$8 sps:$4 sm:$0xff]   ;;  %v1531_v49 = vld [vmem:[#allocation8 + $0x84] ss:$8 sps:$4 sm:$0xff]   ;;  %v1533_v52 = vld [vmem:[#allocation8 + $0x80] ss:$8 sps:$4 sm:$0xff]  }
  0xac   : > { %609 = vmatpush1.bf16.msra.mxu0 %v1449_v9  ;;  %971 = vmatprep.subr.bf16.mxu1 %v1516_v30  ;;  %v1534_v53 = vld [vmem:[#allocation8 + $0x94] ss:$8 sps:$4 sm:$0xff]   ;;  %v1536_v54 = vld [vmem:[#allocation8 + $0x90] ss:$8 sps:$4 sm:$0xff]   ;;  %v1537_v55 = vld [vmem:[#allocation8 + $0xa4] ss:$8 sps:$4 sm:$0xff]  }
  0xad   : > { %610 = vmatprep.subr.bf16.mxu0 %v1450_v10  ;;  %v1488_v56 = vld [vmem:[%s2037_s12 + $0x10] ss:$8 sps:$4 sm:$0xff]   ;;  %v1489_v57 = vld [vmem:[%s2037_s12 + $0x24] ss:$8 sps:$4 sm:$0xff]   ;;  %v1491_v62 = vld [vmem:[%s2037_s12 + $0x20] ss:$8 sps:$4 sm:$0xff]  }
  0xae   : > { %v1539_v58 = vld [vmem:[#allocation8 + $0xa0] ss:$8 sps:$4 sm:$0xff]   ;;  %v1540_v59 = vld [vmem:[#allocation8 + $0xb4] ss:$8 sps:$4 sm:$0xff]   ;;  %v1542_v60 = vld [vmem:[#allocation8 + $0xb0] ss:$8 sps:$4 sm:$0xff]  }
  0xaf   : > { %972 = vmatpush1.bf16.msra.mxu1 %v1518_v33  ;;  %v1543_v61 = vld [vmem:[#allocation8 + $0xc4] ss:$8 sps:$4 sm:$0xff]   ;;  %v1492_v63 = vld [vmem:[%s2037_s12 + $0x34] ss:$8 sps:$4 sm:$0xff]   ;;  %v1545_v0 = vld [vmem:[#allocation8 + $0xc0] ss:$8 sps:$4 sm:$0xff]  }
  0xb0   : > { %611 = vmatpush1.bf16.msra.mxu0 %v1452_v11  ;;  %973 = vmatprep.subr.bf16.mxu1 %v1519_v34  ;;  %v1546_v1 = vld [vmem:[#allocation8 + $0xd4] ss:$8 sps:$4 sm:$0xff]   ;;  %v1495_v3 = vld [vmem:[%s2037_s12 + $0x44] ss:$8 sps:$4 sm:$0xff]   ;;  %v1548_v11 = vld [vmem:[#allocation8 + $0xd0] ss:$8 sps:$4 sm:$0xff]  }
  0xb1   : > { %612 = vmatprep.subr.bf16.mxu0 %v1453_v12  ;;  %v1494_v2 = vld [vmem:[%s2037_s12 + $0x30] ss:$8 sps:$4 sm:$0xff]   ;;  %v1497_v4 = vld [vmem:[%s2037_s12 + $0x40] ss:$8 sps:$4 sm:$0xff]   ;;  %v1498_v5 = vld [vmem:[%s2037_s12 + $0x54] ss:$8 sps:$4 sm:$0xff]  }
  0xb2   : > { %v1500_v6 = vld [vmem:[%s2037_s12 + $0x50] ss:$8 sps:$4 sm:$0xff]   ;;  %v1501_v7 = vld [vmem:[%s2037_s12 + $0x64] ss:$8 sps:$4 sm:$0xff]   ;;  %v1503_v8 = vld [vmem:[%s2037_s12 + $0x60] ss:$8 sps:$4 sm:$0xff]  }
  0xb3   : > { %974 = vmatpush1.bf16.msra.mxu1 %v1521_v37  ;;  %v1504_v9 = vld [vmem:[%s2037_s12 + $0x74] ss:$8 sps:$4 sm:$0xff]   ;;  %v1506_v10 = vld [vmem:[%s2037_s12 + $0x70] ss:$8 sps:$4 sm:$0xff]   ;;  %v1551_v13 = vld [vmem:[#allocation8 + $0xe0] ss:$8 sps:$4 sm:$0xff]  }
  0xb4   : > { %613 = vmatpush1.bf16.msra.mxu0 %v1455_v14  ;;  %975 = vmatprep.subr.bf16.mxu1 %v1522_v38  ;;  %v1549_v12 = vld [vmem:[#allocation8 + $0xe4] ss:$8 sps:$4 sm:$0xff]   ;;  %v1552_v14 = vld [vmem:[#allocation8 + $0xf4] ss:$8 sps:$4 sm:$0xff]   ;;  %s1253_s24 = sshll.u32 %s2033_s28, 8  ;;  %s1343_s23 = sshll.u32 %s1834_s22, 12 }
  0xb5   : > { %614 = vmatprep.subr.bf16.mxu0 %v1456_v15  ;;  %v1554_v15 = vld [vmem:[#allocation8 + $0xf0] ss:$8 sps:$4 sm:$0xff]   ;;  %s2122_s26 = scalar_lea.vmem [#allocation11], %s1253_s24  ;;  %s2187_s16 = scalar_lea.hbm %s2242_s5, %s1343_s23 }
  0xb6   : > { %s1125_s27 = sshll.u32 %s2122_s26, 4  ;;  %s1111_s22 = scalar_lea.sflag [#allocation4], %s2033_s28  ;;  %s2189_s27 = int_to_ptr.vmem [resolvable:$true] %s1125_s27 }
  0xb7   : > { %976 = vmatpush1.bf16.msra.mxu1 %v1524_v40  ;;  %s1697_s6 = scalar_lea.vmem %s2189_s27, 4096  ;;  %s1780_s9 = smov [#allocation11]  }
  0xb8   : > { %615 = vmatpush1.bf16.msra.mxu0 %v1458_v16  ;;  %977 = vmatprep.subr.bf16.mxu1 %v1525_v42  ;;  %v350_v16 = vlaneseq  ;;  %p1698_p3 = scmp.ne.s32.totalorder %s2189_s27, %s1697_s6  ;;  %s1701_s15 = sshll.u32 %s1780_s9, 4  ;;  %s1702_s15 = int_to_ptr.vmem [resolvable:$false] %s1701_s15 }
  0xb9   : > { %616 = vmatprep.subr.bf16.mxu0 %v1459_v17  ;;  %s1703_s29 = scalar_lea.vmem %s1702_s15, 8192  ;;  %p1704_p12 = scmp.lt.s32.totalorder %s2189_s27, %s1702_s15 }
  0xba   : > { %v2067_v17 = vshrl.u32 %v350_v16, 7  ;;  %p1699_p5 = pnand %p1698_p3, %p1978_p10  ;;  %p1705_p1 = scmp.lt.s32.totalorder %s1703_s29, %s1697_s6 }
  0xbb   : > { %978 = vmatpush1.bf16.msra.mxu1 %v1527_v44 }
  0xbc   : > { %617 = vmatpush1.bf16.msra.mxu0 %v1461_v18  ;;  %979 = vmatprep.subr.bf16.mxu1 %v1528_v46  ;;  %v352_v18 = vsub.s32 0, %v2067_v17  ;;  %v356_v20 = vsub.s32 1, %v2067_v17  ;;  %p1700_p7 = pneg %p1699_p5  ;;  %p1706_p2 = por %p1705_p1, %p1704_p12 }
  0xbd   : > { %618 = vmatprep.subr.bf16.mxu0 %v1462_v19  ;;  %v348_v19 = vld [vmem:[#allocation7] sm:$0x3] }
  0xbe   : > { %v2073_v21 = vrot.slane %v348_v19, %v352_v18  ;;  %p1707_p13 = pnand %p1706_p2, %p1700_p7 }
  0xbf   : > { %980 = vmatpush1.bf16.msra.mxu1 %v1530_v48 }
  0xc0   : > { %619 = vmatpush1.bf16.msra.mxu0 %v1464_v22  ;;  %981 = vmatprep.subr.bf16.mxu1 %v1531_v49  ;;  %v2077_v22 = vrot.slane %v348_v19, %v356_v20 }
  0xc1   : > { %620 = vmatprep.subr.bf16.mxu0 %v1465_v24 }
  0xc3   : > { %982 = vmatpush1.bf16.msra.mxu1 %v1533_v52 }
  0xc4   : > { %621 = vmatpush1.bf16.msra.mxu0 %v1467_v27  ;;  %983 = vmatprep.subr.bf16.mxu1 %v1534_v53 }
  0xc5   : > { %622 = vmatprep.subr.bf16.mxu0 %v1468_v28 }
  0xc7   : > { %984 = vmatpush1.bf16.msra.mxu1 %v1536_v54 }
  0xc8   : > { %623 = vmatpush1.bf16.msra.mxu0 %v1470_v31  ;;  %985 = vmatprep.subr.bf16.mxu1 %v1537_v55 }
  0xc9   : > { %624 = vmatprep.subr.bf16.mxu0 %v1471_v32 }
  0xcb   : > { %986 = vmatpush1.bf16.msra.mxu1 %v1539_v58 }
  0xcc   : > { %625 = vmatpush1.bf16.msra.mxu0 %v1473_v35  ;;  %987 = vmatprep.subr.bf16.mxu1 %v1540_v59 }
  0xcd   : > { %626 = vmatprep.subr.bf16.mxu0 %v1474_v36 }
  0xcf   : > { %988 = vmatpush1.bf16.msra.mxu1 %v1542_v60 }
  0xd0   : > { %627 = vmatpush1.bf16.msra.mxu0 %v1476_v39  ;;  %989 = vmatprep.subr.bf16.mxu1 %v1543_v61 }
  0xd1   : > { %628 = vmatprep.subr.bf16.mxu0 %v1477_v41 }
  0xd3   : > { %990 = vmatpush1.bf16.msra.mxu1 %v1545_v0 }
  0xd4   : > { %629 = vmatpush1.bf16.msra.mxu0 %v1479_v43  ;;  %991 = vmatprep.subr.bf16.mxu1 %v1546_v1 }
  0xd5   : > { %630 = vmatprep.subr.bf16.mxu0 %v1480_v45 }
  0xd7   : > { %992 = vmatpush1.bf16.msra.mxu1 %v1548_v11 }
  0xd8   : > { %631 = vmatpush1.bf16.msra.mxu0 %v1482_v47  ;;  %993 = vmatprep.subr.bf16.mxu1 %v1549_v12 }
  0xdb   : > { %633 = vmatmul.mubr.bf16.vlgmr.msra.gmra.mrb[0].mxu0 %v1483_v50  ;;  %994 = vmatpush1.bf16.msra.mxu1 %v1551_v13 }
  0xdc   : > { %642 = vmatprep.mubr.bf16.mxu0 %v1486_v51  ;;  %995 = vmatprep.subr.bf16.mxu1 %v1552_v14 }
  0xdf   : > { %996 = vmatpush1.bf16.msra.mxu1 %v1554_v15 }
  0xe3   : > { %643 = vmatmul.mubr.bf16.gmra.mrb[4].mxu0 %v1488_v56 }
  0xe4   : > { %652 = vmatprep.mubr.bf16.mxu0 %v1489_v57 }
  0xeb   : > { %653 = vmatmul.mubr.bf16.gmra.mrb[8].mxu0 %v1491_v62 }
  0xec   : > { %662 = vmatprep.mubr.bf16.mxu0 %v1492_v63 }
  0xf3   : > { %663 = vmatmul.mubr.bf16.gmra.mrb[12].mxu0 %v1494_v2 }
  0xf4   : > { %672 = vmatprep.mubr.bf16.mxu0 %v1495_v3 }
  0xfb   : > { %673 = vmatmul.mubr.bf16.gmra.mrb[16].mxu0 %v1497_v4 }
  0xfc   : > { %682 = vmatprep.mubr.bf16.mxu0 %v1498_v5 }
 0x103   : > { %683 = vmatmul.mubr.bf16.gmra.mrb[20].mxu0 %v1500_v6 }
 0x104   : > { %692 = vmatprep.mubr.bf16.mxu0 %v1501_v7 }
 0x10b   : > { %693 = vmatmul.mubr.bf16.gmra.mrb[24].mxu0 %v1503_v8 }
 0x10c   : > { %702 = vmatprep.mubr.bf16.mxu0 %v1504_v9 }
 0x113   : > { %703 = vmatmul.mubr.bf16.gmra.mrb[28].mxu0 %v1506_v10 }
 0x1ae   : > { %v634_v23 = vpop.f32.mrb[0].mxu0 }
 0x1af   : > { %v635_v24 = vadd.f32 %v634_v23, %v2073_v21  ;;  %v636_v25 = vpop.f32.mrb[1].mxu0 }
 0x1b0   : > { %v637_v26 = vadd.f32 %v636_v25, %v2077_v22  ;;  %v638_v27 = vpop.f32.mrb[2].mxu0 }
 0x1b1   : > { %v639_v28 = vadd.f32 %v638_v27, %v2073_v21  ;;  %v640_v29 = vpop.f32.mrb[3].mxu0  ;;  %v713_v31 = vmax.f32 %v635_v24, 0.0 }
 0x1b2   : > { %v641_v30 = vadd.f32 %v640_v29, %v2077_v22  ;;  %v714_v33 = vmax.f32 %v637_v26, 0.0 }
 0x1b3   : > { %v715_v32 = vmax.f32 %v639_v28, 0.0 }
 0x1b4   : > { %v716_v34 = vmax.f32 %v641_v30, 0.0 }
 0x1b5   : > { %v745_v35 = vpack.c.bf16 %v715_v32, %v713_v31 }
 0x1b6   : > { %v644_v36 = vpop.f32.mrb[4].mxu0  ;;  %v746_v37 = vpack.c.bf16 %v716_v34, %v714_v33 }
 0x1b7   : > { %v645_v38 = vadd.f32 %v644_v36, %v2073_v21  ;;  %v646_v39 = vpop.f32.mrb[5].mxu0 }
 0x1b8   : > { %v647_v40 = vadd.f32 %v646_v39, %v2077_v22  ;;  %v648_v41 = vpop.f32.mrb[6].mxu0  ;;  %997 = vmatprep.mubr.bf16.mxu1 %v746_v37 }
 0x1b9   : > { %v649_v42 = vadd.f32 %v648_v41, %v2073_v21  ;;  %v650_v43 = vpop.f32.mrb[7].mxu0  ;;  %998 = vmatmul.mubr.bf16.vlgmr.msra.gmra.mrb[0].mxu1 %v745_v35  ;;  %v717_v45 = vmax.f32 %v645_v38, 0.0 }
 0x1ba   : > { %v651_v44 = vadd.f32 %v650_v43, %v2077_v22  ;;  %v718_v47 = vmax.f32 %v647_v40, 0.0 }
 0x1bb   : > { %v719_v46 = vmax.f32 %v649_v42, 0.0 }
 0x1bc   : > { %v720_v48 = vmax.f32 %v651_v44, 0.0 }
 0x1bd   : > { %v747_v49 = vpack.c.bf16 %v719_v46, %v717_v45 }
 0x1be   : > { %v748_v50 = vpack.c.bf16 %v720_v48, %v718_v47  ;;  %v654_v51 = vpop.f32.mrb[8].mxu0 }
 0x1bf   : > { %v655_v52 = vadd.f32 %v654_v51, %v2073_v21  ;;  %v656_v53 = vpop.f32.mrb[9].mxu0 }
 0x1c0   : > { %v657_v54 = vadd.f32 %v656_v53, %v2077_v22  ;;  %v658_v55 = vpop.f32.mrb[10].mxu0  ;;  %1007 = vmatprep.mubr.bf16.mxu1 %v748_v50 }
 0x1c1   : > { %v659_v56 = vadd.f32 %v658_v55, %v2073_v21  ;;  %v660_v57 = vpop.f32.mrb[11].mxu0  ;;  %1008 = vmatmul.mubr.bf16.gmra.mrb[4].mxu1 %v747_v49  ;;  %v721_v59 = vmax.f32 %v655_v52, 0.0 }
 0x1c2   : > { %v661_v58 = vadd.f32 %v660_v57, %v2077_v22  ;;  %v722_v61 = vmax.f32 %v657_v54, 0.0 }
 0x1c3   : > { %v723_v60 = vmax.f32 %v659_v56, 0.0 }
 0x1c4   : > { %v724_v62 = vmax.f32 %v661_v58, 0.0 }
 0x1c5   : > { %v749_v63 = vpack.c.bf16 %v723_v60, %v721_v59 }
 0x1c6   : > { %v750_v0 = vpack.c.bf16 %v724_v62, %v722_v61  ;;  %v664_v1 = vpop.f32.mrb[12].mxu0 }
 0x1c7   : > { %v665_v2 = vadd.f32 %v664_v1, %v2073_v21  ;;  %v666_v3 = vpop.f32.mrb[13].mxu0 }
 0x1c8   : > { %v667_v4 = vadd.f32 %v666_v3, %v2077_v22  ;;  %v668_v5 = vpop.f32.mrb[14].mxu0  ;;  %1017 = vmatprep.mubr.bf16.mxu1 %v750_v0 }
 0x1c9   : > { %v669_v6 = vadd.f32 %v668_v5, %v2073_v21  ;;  %v670_v7 = vpop.f32.mrb[15].mxu0  ;;  %1018 = vmatmul.mubr.bf16.gmra.mrb[8].mxu1 %v749_v63  ;;  %v725_v9 = vmax.f32 %v665_v2, 0.0 }
 0x1ca   : > { %v671_v8 = vadd.f32 %v670_v7, %v2077_v22  ;;  %v726_v11 = vmax.f32 %v667_v4, 0.0 }
 0x1cb   : > { %v727_v10 = vmax.f32 %v669_v6, 0.0 }
 0x1cc   : > { %v728_v12 = vmax.f32 %v671_v8, 0.0 }
 0x1cd   : > { %v751_v13 = vpack.c.bf16 %v727_v10, %v725_v9 }
 0x1ce   : > { %v752_v14 = vpack.c.bf16 %v728_v12, %v726_v11  ;;  %v674_v15 = vpop.f32.mrb[16].mxu0  ;;  %v793_v12 = vld [vmem:[#allocation10] sm:$0x3] }
 0x1cf   : > { %v675_v16 = vadd.f32 %v674_v15, %v2073_v21  ;;  %v676_v19 = vpop.f32.mrb[17].mxu0 }
 0x1d0   : > { %v677_v23 = vadd.f32 %v676_v19, %v2077_v22  ;;  %v678_v24 = vpop.f32.mrb[18].mxu0  ;;  %1027 = vmatprep.mubr.bf16.mxu1 %v752_v14 }
 0x1d1   : > { %v679_v25 = vadd.f32 %v678_v24, %v2073_v21  ;;  %v680_v26 = vpop.f32.mrb[19].mxu0  ;;  %1028 = vmatmul.mubr.bf16.gmra.mrb[12].mxu1 %v751_v13  ;;  %v729_v28 = vmax.f32 %v675_v16, 0.0  ;;  %v2114_v13 = vrot.slane %v793_v12, %v352_v18 }
 0x1d2   : > { %v681_v27 = vadd.f32 %v680_v26, %v2077_v22  ;;  %v730_v30 = vmax.f32 %v677_v23, 0.0 }
 0x1d3   : > { %v731_v29 = vmax.f32 %v679_v25, 0.0 }
 0x1d4   : > { %v732_v31 = vmax.f32 %v681_v27, 0.0 }
 0x1d5   : > { %v753_v32 = vpack.c.bf16 %v731_v29, %v729_v28 }
 0x1d6   : > { %v754_v33 = vpack.c.bf16 %v732_v31, %v730_v30  ;;  %v684_v34 = vpop.f32.mrb[20].mxu0 }
 0x1d7   : > { %v685_v35 = vadd.f32 %v684_v34, %v2073_v21  ;;  %v686_v36 = vpop.f32.mrb[21].mxu0 }
 0x1d8   : > { %v687_v37 = vadd.f32 %v686_v36, %v2077_v22  ;;  %v688_v38 = vpop.f32.mrb[22].mxu0  ;;  %1037 = vmatprep.mubr.bf16.mxu1 %v754_v33 }
 0x1d9   : > { %v689_v39 = vadd.f32 %v688_v38, %v2073_v21  ;;  %v690_v40 = vpop.f32.mrb[23].mxu0  ;;  %1038 = vmatmul.mubr.bf16.gmra.mrb[16].mxu1 %v753_v32  ;;  %v733_v42 = vmax.f32 %v685_v35, 0.0 }
 0x1da   : > { %v691_v41 = vadd.f32 %v690_v40, %v2077_v22  ;;  %v734_v44 = vmax.f32 %v687_v37, 0.0 }
 0x1db   : > { %v735_v43 = vmax.f32 %v689_v39, 0.0 }
 0x1dc   : > { %v736_v45 = vmax.f32 %v691_v41, 0.0 }
 0x1dd   : > { %v755_v46 = vpack.c.bf16 %v735_v43, %v733_v42 }
 0x1de   : > { %v756_v47 = vpack.c.bf16 %v736_v45, %v734_v44  ;;  %v694_v48 = vpop.f32.mrb[24].mxu0 }
 0x1df   : > { %v695_v49 = vadd.f32 %v694_v48, %v2073_v21  ;;  %v696_v50 = vpop.f32.mrb[25].mxu0 }
 0x1e0   : > { %v697_v51 = vadd.f32 %v696_v50, %v2077_v22  ;;  %v698_v52 = vpop.f32.mrb[26].mxu0  ;;  %1047 = vmatprep.mubr.bf16.mxu1 %v756_v47 }
 0x1e1   : > { %v699_v53 = vadd.f32 %v698_v52, %v2073_v21  ;;  %v700_v54 = vpop.f32.mrb[27].mxu0  ;;  %1048 = vmatmul.mubr.bf16.gmra.mrb[20].mxu1 %v755_v46  ;;  %v737_v56 = vmax.f32 %v695_v49, 0.0 }
 0x1e2   : > { %v701_v55 = vadd.f32 %v700_v54, %v2077_v22  ;;  %v738_v58 = vmax.f32 %v697_v51, 0.0 }
 0x1e3   : > { %v739_v57 = vmax.f32 %v699_v53, 0.0 }
 0x1e4   : > { %v740_v59 = vmax.f32 %v701_v55, 0.0 }
 0x1e5   : > { %v757_v60 = vpack.c.bf16 %v739_v57, %v737_v56 }
 0x1e6   : > { %v758_v61 = vpack.c.bf16 %v740_v59, %v738_v58  ;;  %v704_v62 = vpop.f32.mrb[28].mxu0 }
 0x1e7   : > { %v705_v63 = vadd.f32 %v704_v62, %v2073_v21  ;;  %v706_v0 = vpop.f32.mrb[29].mxu0 }
 0x1e8   : > { %v707_v1 = vadd.f32 %v706_v0, %v2077_v22  ;;  %v708_v2 = vpop.f32.mrb[30].mxu0  ;;  %1057 = vmatprep.mubr.bf16.mxu1 %v758_v61 }
 0x1e9   : > { %v709_v3 = vadd.f32 %v708_v2, %v2073_v21  ;;  %v710_v4 = vpop.f32.mrb[31].mxu0  ;;  %1058 = vmatmul.mubr.bf16.gmra.mrb[24].mxu1 %v757_v60  ;;  %v741_v6 = vmax.f32 %v705_v63, 0.0  ;;  %v2118_v21 = vrot.slane %v793_v12, %v356_v20 }
 0x1ea   : > { %v711_v5 = vadd.f32 %v710_v4, %v2077_v22  ;;  %v742_v8 = vmax.f32 %v707_v1, 0.0 }
 0x1eb   : > { %v743_v7 = vmax.f32 %v709_v3, 0.0 }
 0x1ec   : > { %v744_v9 = vmax.f32 %v711_v5, 0.0 }
 0x1ed   : > { %v759_v10 = vpack.c.bf16 %v743_v7, %v741_v6 }
 0x1ee   : > { %v760_v11 = vpack.c.bf16 %v744_v9, %v742_v8 }
 0x1f0   : > { %1067 = vmatprep.mubr.bf16.mxu1 %v760_v11 }
 0x1f1   : > { %1068 = vmatmul.mubr.bf16.gmra.mrb[28].mxu1 %v759_v10 }
 0x28c   : > { %v999_v14 = vpop.f32.mrb[0].mxu1 }
 0x28d   : > { %v1000_v22 = vadd.f32 %v999_v14, %v2114_v13  ;;  %v1001_v15 = vpop.f32.mrb[1].mxu1 }
 0x28e   : > { %v1002_v16 = vadd.f32 %v1001_v15, %v2118_v21  ;;  %v1003_v19 = vpop.f32.mrb[2].mxu1 }
 0x28f   : > { %1078 = vst [vmem:[%s2122_s26] sm:$0xff] %v1000_v22  ;;  %v1004_v17 = vadd.f32 %v1003_v19, %v2114_v13  ;;  %v1005_v18 = vpop.f32.mrb[3].mxu1 }
 0x290   : > { %1079 = vst [vmem:[%s2122_s26 + $0x8] sm:$0xff] %v1002_v16  ;;  %v1006_v20 = vadd.f32 %v1005_v18, %v2118_v21 }
 0x291   : > { %1080 = vst [vmem:[%s2122_s26 + $0x10] sm:$0xff] %v1004_v17 }
 0x292   : > { %1081 = vst [vmem:[%s2122_s26 + $0x18] sm:$0xff] %v1006_v20 }
 0x294   : > { %v1009_v23 = vpop.f32.mrb[4].mxu1 }
 0x295   : > { %v1010_v24 = vadd.f32 %v1009_v23, %v2114_v13  ;;  %v1011_v25 = vpop.f32.mrb[5].mxu1 }
 0x296   : > { %v1012_v26 = vadd.f32 %v1011_v25, %v2118_v21  ;;  %v1013_v27 = vpop.f32.mrb[6].mxu1 }
 0x297   : > { %1082 = vst [vmem:[%s2122_s26 + $0x20] sm:$0xff] %v1010_v24  ;;  %v1014_v28 = vadd.f32 %v1013_v27, %v2114_v13  ;;  %v1015_v29 = vpop.f32.mrb[7].mxu1 }
 0x298   : > { %1083 = vst [vmem:[%s2122_s26 + $0x28] sm:$0xff] %v1012_v26  ;;  %v1016_v30 = vadd.f32 %v1015_v29, %v2118_v21 }
 0x299   : > { %1084 = vst [vmem:[%s2122_s26 + $0x30] sm:$0xff] %v1014_v28 }
 0x29a   : > { %1085 = vst [vmem:[%s2122_s26 + $0x38] sm:$0xff] %v1016_v30 }
 0x29c   : > { %v1019_v31 = vpop.f32.mrb[8].mxu1 }
 0x29d   : > { %v1020_v32 = vadd.f32 %v1019_v31, %v2114_v13  ;;  %v1021_v33 = vpop.f32.mrb[9].mxu1 }
 0x29e   : > { %v1022_v34 = vadd.f32 %v1021_v33, %v2118_v21  ;;  %v1023_v35 = vpop.f32.mrb[10].mxu1 }
 0x29f   : > { %1086 = vst [vmem:[%s2122_s26 + $0x40] sm:$0xff] %v1020_v32  ;;  %v1024_v36 = vadd.f32 %v1023_v35, %v2114_v13  ;;  %v1025_v37 = vpop.f32.mrb[11].mxu1 }
 0x2a0   : > { %1087 = vst [vmem:[%s2122_s26 + $0x48] sm:$0xff] %v1022_v34  ;;  %v1026_v38 = vadd.f32 %v1025_v37, %v2118_v21 }
 0x2a1   : > { %1088 = vst [vmem:[%s2122_s26 + $0x50] sm:$0xff] %v1024_v36 }
 0x2a2   : > { %1089 = vst [vmem:[%s2122_s26 + $0x58] sm:$0xff] %v1026_v38 }
 0x2a4   : > { %v1029_v39 = vpop.f32.mrb[12].mxu1 }
 0x2a5   : > { %v1030_v40 = vadd.f32 %v1029_v39, %v2114_v13  ;;  %v1031_v41 = vpop.f32.mrb[13].mxu1 }
 0x2a6   : > { %v1032_v42 = vadd.f32 %v1031_v41, %v2118_v21  ;;  %v1033_v43 = vpop.f32.mrb[14].mxu1 }
 0x2a7   : > { %1090 = vst [vmem:[%s2122_s26 + $0x60] sm:$0xff] %v1030_v40  ;;  %v1034_v44 = vadd.f32 %v1033_v43, %v2114_v13  ;;  %v1035_v45 = vpop.f32.mrb[15].mxu1 }
 0x2a8   : > { %1091 = vst [vmem:[%s2122_s26 + $0x68] sm:$0xff] %v1032_v42  ;;  %v1036_v46 = vadd.f32 %v1035_v45, %v2118_v21 }
 0x2a9   : > { %1092 = vst [vmem:[%s2122_s26 + $0x70] sm:$0xff] %v1034_v44 }
 0x2aa   : > { %1093 = vst [vmem:[%s2122_s26 + $0x78] sm:$0xff] %v1036_v46 }
 0x2ac   : > { %v1039_v47 = vpop.f32.mrb[16].mxu1 }
 0x2ad   : > { %v1040_v48 = vadd.f32 %v1039_v47, %v2114_v13  ;;  %v1041_v49 = vpop.f32.mrb[17].mxu1 }
 0x2ae   : > { %v1042_v50 = vadd.f32 %v1041_v49, %v2118_v21  ;;  %v1043_v51 = vpop.f32.mrb[18].mxu1 }
 0x2af   : > { %1094 = vst [vmem:[%s2122_s26 + $0x80] sm:$0xff] %v1040_v48  ;;  %v1044_v52 = vadd.f32 %v1043_v51, %v2114_v13  ;;  %v1045_v53 = vpop.f32.mrb[19].mxu1 }
 0x2b0   : > { %1095 = vst [vmem:[%s2122_s26 + $0x88] sm:$0xff] %v1042_v50  ;;  %v1046_v54 = vadd.f32 %v1045_v53, %v2118_v21 }
 0x2b1   : > { %1096 = vst [vmem:[%s2122_s26 + $0x90] sm:$0xff] %v1044_v52 }
 0x2b2   : > { %1097 = vst [vmem:[%s2122_s26 + $0x98] sm:$0xff] %v1046_v54 }
 0x2b4   : > { %v1049_v55 = vpop.f32.mrb[20].mxu1 }
 0x2b5   : > { %v1050_v56 = vadd.f32 %v1049_v55, %v2114_v13  ;;  %v1051_v57 = vpop.f32.mrb[21].mxu1 }
 0x2b6   : > { %v1052_v58 = vadd.f32 %v1051_v57, %v2118_v21  ;;  %v1053_v59 = vpop.f32.mrb[22].mxu1 }
 0x2b7   : > { %1098 = vst [vmem:[%s2122_s26 + $0xa0] sm:$0xff] %v1050_v56  ;;  %v1054_v60 = vadd.f32 %v1053_v59, %v2114_v13  ;;  %v1055_v61 = vpop.f32.mrb[23].mxu1 }
 0x2b8   : > { %1099 = vst [vmem:[%s2122_s26 + $0xa8] sm:$0xff] %v1052_v58  ;;  %v1056_v62 = vadd.f32 %v1055_v61, %v2118_v21 }
 0x2b9   : > { %1100 = vst [vmem:[%s2122_s26 + $0xb0] sm:$0xff] %v1054_v60 }
 0x2ba   : > { %1101 = vst [vmem:[%s2122_s26 + $0xb8] sm:$0xff] %v1056_v62 }
 0x2bc   : > { %v1059_v63 = vpop.f32.mrb[24].mxu1 }
 0x2bd   : > { %v1060_v0 = vadd.f32 %v1059_v63, %v2114_v13  ;;  %v1061_v1 = vpop.f32.mrb[25].mxu1 }
 0x2be   : > { %v1062_v2 = vadd.f32 %v1061_v1, %v2118_v21  ;;  %v1063_v3 = vpop.f32.mrb[26].mxu1 }
 0x2bf   : > { %1102 = vst [vmem:[%s2122_s26 + $0xc0] sm:$0xff] %v1060_v0  ;;  %v1064_v4 = vadd.f32 %v1063_v3, %v2114_v13  ;;  %v1065_v5 = vpop.f32.mrb[27].mxu1 }
 0x2c0   : > { %1103 = vst [vmem:[%s2122_s26 + $0xc8] sm:$0xff] %v1062_v2  ;;  %v1066_v6 = vadd.f32 %v1065_v5, %v2118_v21 }
 0x2c1   : > { %1104 = vst [vmem:[%s2122_s26 + $0xd0] sm:$0xff] %v1064_v4 }
 0x2c2   : > { %1105 = vst [vmem:[%s2122_s26 + $0xd8] sm:$0xff] %v1066_v6 }
 0x2c4   : > { %v1069_v7 = vpop.f32.mrb[28].mxu1 }
 0x2c5   : > { %v1070_v8 = vadd.f32 %v1069_v7, %v2114_v13  ;;  %v1071_v9 = vpop.f32.mrb[29].mxu1 }
 0x2c6   : > { %v1072_v10 = vadd.f32 %v1071_v9, %v2118_v21  ;;  %v1073_v11 = vpop.f32.mrb[30].mxu1 }
 0x2c7   : > { %1106 = vst [vmem:[%s2122_s26 + $0xe0] sm:$0xff] %v1070_v8  ;;  %v1074_v12 = vadd.f32 %v1073_v11, %v2114_v13  ;;  %v1075_v14 = vpop.f32.mrb[31].mxu1 }
 0x2c8   : > { %1107 = vst [vmem:[%s2122_s26 + $0xe8] sm:$0xff] %v1072_v10  ;;  %v1076_v22 = vadd.f32 %v1075_v14, %v2118_v21 }
 0x2c9   : > { %1108 = vst [vmem:[%s2122_s26 + $0xf0] sm:$0xff] %v1074_v12 }
 0x2ca   : > { %1109 = vst [vmem:[%s2122_s26 + $0xf8] sm:$0xff] %v1076_v22 }
 0x2cb   : > { %1710 = shalt.err (!%p1707_p13)
}
 0x2cc   : > { %s1711_s10 = scalar_lea.hbm %s2187_s16, 4096  ;;  %s1715_s12 = scalar_lea.hbm %s2242_s5, 8192 }
 0x2cd   : > { %p1712_p9 = scmp.ne.s32.totalorder %s2187_s16, %s1711_s10  ;;  %p1716_p6 = scmp.lt.u32.totalorder %s2187_s16, %s2242_s5 }
 0x2ce   : > { %p1717_p4 = scmp.lt.u32.totalorder %s1715_s12, %s1711_s10  ;;  %p1719_p3 = scmp.lt.u32.totalorder %s1711_s10, %s2187_s16 }
 0x2cf   : > { %p1713_p0 = pnand %p1712_p9, %p1978_p10 }
 0x2d0   : > { %p1718_p8 = por %p1717_p4, %p1716_p6 }
 0x2d1   : > { %p1714_p11 = pneg %p1713_p0 }
 0x2d2   : > { %p1720_p5 = por %p1719_p3, %p1718_p8 }
 0x2d4   : > { %p1721_p7 = pnand %p1720_p5, %p1714_p11 }
 0x2d6   : > { %1724 = shalt.err (!%p1721_p7)
}
 0x2d7   : > { %s1781_s23 = smov 256   ;;  %s1782_s13 = smov 16  }
 0x2d8   : > { %1362 = dma.vmem_to_hbm [thread:$0]  (%p1978_p10), %s2189_s27, 4096, %s2187_s16, %s1111_s22, %s1781_s23, %s1781_s23, %s1782_s13  }
 0x2d9 PF: > { %s1140_s8 = sand.u32 1, %s1759_s18   ;;  %p2260_p12 = scmp.ne.s32.totalorder %s2247_s25, 0 }
 0x2da   : > { %p2261_p1 = scmp.ge.s32.totalorder %s1771_s21, 2  ;;  %s1141_s6 = scalar_lea.sflag [#allocation4], %s1140_s8 }
 0x2dc   : > { %p1382_p2 = pnand %p2261_p1, %p2260_p12 }
 0x2de   : > { %1754 = dma.done.wait (!%p1382_p2), %s1141_s6, 4096  }
 0x2df   : > { %1756 = vsyncadd (!%p1382_p2), %s1141_s6, 4294963200  ;;  %p20_p13 = scmp.ge.s32.totalorder %s1968_s14, 4   ;;  %s2262_s18 = smov %s1763_s19 }
 0x2e0   : > { %s2263_s19 = smov %s1767_s20  ;;  %s2264_s20 = smov %s1984_s7 }
 0x2e1   : > { %s2265_s21 = smov %s1968_s14  ;;  %22 = sbr.rel (!%p20_p13) target bundleno = 7 (0x7), region = 101 }
 0x2e8   :  { %1146 = vsyncpa [#allocation3], 1 }
 0x2e9   :  { %1148 = vsyncpa [#allocation3 + $0x1], 1 }
 0x2ea   :  { %1149 = vsyncpa [#allocation6], 1 }
 0x2eb   :  { %1150 = vsyncpa [#allocation9], 1 }
 0x2ec   :  { %1151 = vsyncpa [#allocation4], 1 }
 0x2ed   :  { %1153 = vsyncpa [#allocation4 + $0x1], 1 }

// kernel: tpu_custom_call.1
= control target key start
LH: loop header
LB: loop body
LE: loop exit
PB: predicated region body
PF: predicated region fallthrough
CT: control target
= control target key end

     0   :  { %10 = vsyncpa [#allocation3], 0  ;;  %s2237_s0 = inlined_call_operand.hbm [shape: bf16[256,256], index: 0, kind: input, shape index: {}]   ;;  %s2238_s1 = inlined_call_operand.hbm [shape: bf16[256,256], index: 1, kind: input, shape index: {}]   ;;  %s2239_s2 = inlined_call_operand.hbm [shape: f32[1,256], index: 2, kind: input, shape index: {}]   ;;  %s2240_s3 = inlined_call_operand.hbm [shape: bf16[256,256], index: 3, kind: input, shape index: {}]   ;;  %s2241_s4 = inlined_call_operand.hbm [shape: f32[1,256], index: 4, kind: input, shape index: {}]   ;;  %s2242_s5 = inlined_call_operand.hbm [shape: f32[256,256], index: 5, kind: output, shape index: {}]  }
   0x1   :  { %12 = vsyncpa [#allocation3 + $0x1], 0 }
   0x2   :  { %13 = vsyncpa [#allocation6], 0 }
   0x3   :  { %14 = vsyncpa [#allocation9], 0 }
   0x4   :  { %15 = vsyncpa [#allocation4], 0 }
   0x5   :  { %17 = vsyncpa [#allocation4 + $0x1], 0  ;;  %s1813_s18 = smov 0   ;;  %s1815_s19 = smov 0  }
   0x6   :  { %s1817_s20 = smov 0   ;;  %s1819_s21 = smov 0  }
   0x7 LB: > { %s1834_s22 = sadd.s32 4294967295, %s1771_s21   ;;  %s1236_s23 = sadd.s32 4294967294, %s1771_s21   ;;  %s1771_s21 = sphi %s1819_s21, %s2265_s21   ;;  %s1767_s20 = sphi %s1817_s20, %s2264_s20   ;;  %s1763_s19 = sphi %s1815_s19, %s2263_s19   ;;  %s1759_s18 = sphi %s1813_s18, %s2262_s18  }
   0x8   : > { %p43_p0 = scmp.ne.s32.totalorder %s1763_s19, %s1759_s18  ;;  %p2243_p1 = scmp.eq.s32.totalorder %s1834_s22, 0 }
   0x9   : > { %p157_p3 = scmp.eq.s32.totalorder %s1236_s23, 1  ;;  %p1237_p5 = scmp.ge.s32.totalorder %s1771_s21, 1 }
   0xa   : > { %p1843_p4 = por %p2243_p1, %p43_p0  ;;  %p164_p7 = scmp.lt.s32.totalorder %s1771_s21, 3 }
   0xb   : > { %p1848_p6 = por %p157_p3, %p43_p0  ;;  %s1773_s27 = smov [#allocation5]  }
   0xc   : > { %s2246_s24 = scalar_select %p1843_p4, 1, 0 }
   0xd   : > { %s2247_s25 = scalar_select %p1848_p6, 1, 0 }
   0xe   : > { %p1853_p8 = pnand %p1237_p5, %p164_p7  ;;  %s176_s28 = sshll.u32 %s1773_s27, 4  ;;  %s1857_s28 = int_to_ptr.vmem [resolvable:$true] %s176_s28 }
   0xf   : > { %s1774_s30 = smov [#allocation8]   ;;  %s1775_s7 = smov [#allocation7]  }
  0x10   : > { %s2248_s26 = scalar_select %p1853_p8, 1, 0 }
  0x11   : > { %p1364_p9 = pneg %p1853_p8  ;;  %s200_s6 = sshll.u32 %s1774_s30, 4  ;;  %s1868_s6 = int_to_ptr.vmem [resolvable:$true] %s200_s6 }
  0x12   : > { %s1870_s8 = sshll.u32 %s1775_s7, 4  ;;  %s1555_s11 = scalar_lea.hbm %s2238_s1, 4096  ;;  %s191_s8 = int_to_ptr.vmem [resolvable:$true] %s1870_s8 }
  0x13   : > { %p1864_p11 = pnand %p1364_p9, %p2243_p1  ;;  %p1556_p12 = scmp.ne.s32.totalorder %s2238_s1, %s1555_s11 }
  0x14   : > { %p1562_p5 = scmp.lt.u32.totalorder %s1555_s11, %s2238_s1 }
  0x15   : > { %p1880_p13 = pneg %p1864_p11 }
  0x17   : > { %p1558_p0 = pnand %p1880_p13, %p1556_p12 }
  0x19   : > { %p1559_p3 = pneg %p1558_p0 }
  0x1b   : > { %p1564_p7 = pnand %p1562_p5, %p1559_p3 }
  0x1d   : > { %1567 = shalt.err (!%p1564_p7)
}
  0x1e   : > { %s1568_s17 = scalar_lea.vmem %s1857_s28, 4096  ;;  %p1576_p2 = scmp.lt.s32.totalorder %s1857_s28, %s1857_s28 }
  0x1f   : > { %p1569_p9 = scmp.ne.s32.totalorder %s1857_s28, %s1568_s17  ;;  %p1577_p6 = scmp.lt.s32.totalorder %s1568_s17, %s1568_s17 }
  0x21   : > { %p1571_p10 = pnand %p1569_p9, %p1880_p13  ;;  %p1578_p12 = por %p1577_p6, %p1576_p2 }
  0x23   : > { %p1572_p1 = pneg %p1571_p10 }
  0x25   : > { %p1579_p0 = pnand %p1578_p12, %p1572_p1 }
  0x27   : > { %1582 = shalt.err (!%p1579_p0)
}
  0x28   : > { %s1776_s23 = smov 128   ;;  %s1777_s27 = smov 8  }
  0x29   : > { %1367 = dma.hbm_to_vmem [thread:$0]  (!%p1864_p11), %s2238_s1, 4096, %s1857_s28, [#allocation6], %s1776_s23, %s1776_s23, %s1777_s27  }
  0x2a   : > { %s1583_s11 = scalar_lea.hbm %s2240_s3, 4096 }
  0x2b   : > { %p1584_p1 = scmp.ne.s32.totalorder %s2240_s3, %s1583_s11  ;;  %p1590_p10 = scmp.lt.u32.totalorder %s1583_s11, %s2240_s3 }
  0x2d   : > { %p1586_p2 = pnand %p1584_p1, %p1880_p13 }
  0x2f   : > { %p1587_p6 = pneg %p1586_p2 }
  0x31   : > { %p1592_p3 = pnand %p1590_p10, %p1587_p6 }
  0x33   : > { %1595 = shalt.err (!%p1592_p3)
}
  0x34   : > { %s1596_s28 = scalar_lea.vmem %s1868_s6, 4096  ;;  %p1604_p12 = scmp.lt.s32.totalorder %s1868_s6, %s1868_s6 }
  0x35   : > { %p1597_p5 = scmp.ne.s32.totalorder %s1868_s6, %s1596_s28  ;;  %p1605_p0 = scmp.lt.s32.totalorder %s1596_s28, %s1596_s28 }
  0x37   : > { %p1599_p7 = pnand %p1597_p5, %p1880_p13  ;;  %p1606_p1 = por %p1605_p0, %p1604_p12 }
  0x39   : > { %p1600_p9 = pneg %p1599_p7 }
  0x3b   : > { %p1607_p2 = pnand %p1606_p1, %p1600_p9 }
  0x3d   : > { %1610 = shalt.err (!%p1607_p2)
}
  0x3e   : > { %1373 = dma.hbm_to_vmem [thread:$0]  (!%p1864_p11), %s2240_s3, 4096, %s1868_s6, [#allocation9], %s1776_s23, %s1776_s23, %s1777_s27  }
  0x3f   : > { %s1611_s10 = scalar_lea.hbm %s2239_s2, 32 }
  0x40   : > { %p1612_p6 = scmp.ne.s32.totalorder %s2239_s2, %s1611_s10  ;;  %p1618_p5 = scmp.lt.u32.totalorder %s1611_s10, %s2239_s2 }
  0x42   : > { %p1614_p10 = pnand %p1612_p6, %p1880_p13 }
  0x44   : > { %p1615_p3 = pneg %p1614_p10 }
  0x46   : > { %p1620_p7 = pnand %p1618_p5, %p1615_p3 }
  0x48   : > { %1623 = shalt.err (!%p1620_p7)
}
  0x49   : > { %s1624_s16 = scalar_lea.vmem %s191_s8, 32  ;;  %p1632_p1 = scmp.lt.s32.totalorder %s191_s8, %s191_s8 }
  0x4a   : > { %p1625_p9 = scmp.ne.s32.totalorder %s191_s8, %s1624_s16  ;;  %p1633_p2 = scmp.lt.s32.totalorder %s1624_s16, %s1624_s16 }
  0x4c   : > { %p1627_p12 = pnand %p1625_p9, %p1880_p13  ;;  %p1634_p4 = por %p1633_p2, %p1632_p1 }
  0x4e   : > { %p1628_p0 = pneg %p1627_p12 }
  0x50   : > { %p1635_p8 = pnand %p1634_p4, %p1628_p0 }
  0x52   : > { %1638 = shalt.err (!%p1635_p8)
}
  0x53   : > { %1370 = dma.hbm_to_vmem [thread:$0]  (!%p1864_p11), %s2239_s2, 32, %s191_s8, [#allocation6]  }
  0x54   : > { %s1778_s17 = smov [#allocation10]   ;;  %s1639_s10 = scalar_lea.hbm %s2241_s4, 32 }
  0x55   : > { %s214_s30 = sshll.u32 %s1778_s17, 4  ;;  %p1640_p6 = scmp.ne.s32.totalorder %s2241_s4, %s1639_s10  ;;  %s215_s30 = int_to_ptr.vmem [resolvable:$true] %s214_s30 }
  0x56   : > { %p1646_p10 = scmp.lt.u32.totalorder %s1639_s10, %s2241_s4 }
  0x57   : > { %p1642_p4 = pnand %p1640_p6, %p1880_p13 }
  0x59   : > { %p1643_p8 = pneg %p1642_p4 }
  0x5b   : > { %p1648_p3 = pnand %p1646_p10, %p1643_p8 }
  0x5d   : > { %1651 = shalt.err (!%p1648_p3)
}
  0x5e   : > { %s1652_s8 = scalar_lea.vmem %s215_s30, 32  ;;  %p1660_p12 = scmp.lt.s32.totalorder %s215_s30, %s215_s30 }
  0x5f   : > { %p1653_p5 = scmp.ne.s32.totalorder %s215_s30, %s1652_s8  ;;  %p1661_p0 = scmp.lt.s32.totalorder %s1652_s8, %s1652_s8 }
  0x61   : > { %p1655_p7 = pnand %p1653_p5, %p1880_p13  ;;  %p1662_p1 = por %p1661_p0, %p1660_p12 }
  0x63   : > { %p1656_p9 = pneg %p1655_p7 }
  0x65   : > { %p1663_p2 = pnand %p1662_p1, %p1656_p9 }
  0x67   : > { %1666 = shalt.err (!%p1663_p2)
}
  0x68   : > { %1376 = dma.hbm_to_vmem [thread:$0]  (!%p1864_p11), %s2241_s4, 32, %s215_s30, [#allocation9]  }
  0x69   : > { %s1968_s14 = sadd.s32 1, %s1771_s21   ;;  %s30_s28 = sadd.s32 1, %s1767_s20 }
  0x6a   : > { %s27_s29 = ssub.s32 %s1771_s21, %s1968_s14  ;;  %p37_p13 = scmp.ne.s32.totalorder %s1767_s20, %s1763_s19 }
  0x6b   : > { %p28_p6 = scmp.eq.s32.totalorder %s27_s29, 0  ;;  %p38_p4 = scmp.eq.s32.totalorder %s1771_s21, 0 }
  0x6c   : > { %p2251_p8 = scmp.eq.s32.totalorder %s1834_s22, 1  ;;  %p1389_p3 = scmp.lt.s32.totalorder %s1771_s21, 2 }
  0x6d   : > { %s1984_s7 = scalar_select %p28_p6, %s1767_s20, %s30_s28  }
  0x6e   : > { %p1978_p10 = por %p2251_p8, %p37_p13  ;;  %p39_p5 = por %p38_p4, %p37_p13 }
  0x6f   : > { %s225_s9 = sand.u32 1, %s1767_s20   ;;  %s1341_s30 = sshll.u32 %s1771_s21, 11 }
  0x70   : > { %s1243_s10 = sshll.u32 %s225_s9, 7  ;;  %s1991_s13 = scalar_lea.hbm %s2237_s0, %s1341_s30 }
  0x71   : > { %s229_s15 = scalar_lea.vmem [#allocation2], %s1243_s10  ;;  %p1995_p11 = pnand %p1389_p3, %p39_p5 }
  0x72   : > { %s237_s8 = sshll.u32 %s229_s15, 4  ;;  %s1999_s6 = scalar_lea.sflag [#allocation3], %s225_s9  ;;  %s1993_s8 = int_to_ptr.vmem [resolvable:$true] %s237_s8 }
  0x73   : > { %s1667_s28 = scalar_lea.hbm %s1991_s13, 2048  ;;  %p1669_p9 = pneg %p1995_p11 }
  0x74   : > { %p1668_p7 = scmp.ne.s32.totalorder %s1991_s13, %s1667_s28  ;;  %s1672_s30 = scalar_lea.hbm %s2237_s0, 4096 }
  0x75   : > { %p1673_p1 = scmp.lt.u32.totalorder %s1991_s13, %s2237_s0  ;;  %p1674_p2 = scmp.lt.u32.totalorder %s1672_s30, %s1667_s28 }
  0x76   : > { %p1670_p12 = pnand %p1669_p9, %p1668_p7  ;;  %p1676_p6 = scmp.lt.u32.totalorder %s1667_s28, %s1991_s13 }
  0x77   : > { %p1675_p13 = por %p1674_p2, %p1673_p1 }
  0x78   : > { %p1671_p0 = pneg %p1670_p12 }
  0x79   : > { %p1677_p4 = por %p1676_p6, %p1675_p13 }
  0x7b   : > { %p1678_p8 = pnand %p1677_p4, %p1671_p0 }
  0x7d   : > { %1681 = shalt.err (!%p1678_p8)
}
  0x7e   : > { %s1682_s9 = scalar_lea.vmem %s1993_s8, 2048  ;;  %s1779_s15 = smov [#allocation2]  }
  0x7f   : > { %p1683_p3 = scmp.ne.s32.totalorder %s1993_s8, %s1682_s9  ;;  %s1687_s29 = sshll.u32 %s1779_s15, 4  ;;  %s1688_s29 = int_to_ptr.vmem [resolvable:$false] %s1687_s29 }
  0x80   : > { %s1689_s10 = scalar_lea.vmem %s1688_s29, 4096  ;;  %p1690_p12 = scmp.lt.s32.totalorder %s1993_s8, %s1688_s29 }
  0x81   : > { %p1685_p5 = pnand %p1683_p3, %p1669_p9  ;;  %p1691_p1 = scmp.lt.s32.totalorder %s1689_s10, %s1682_s9 }
  0x83   : > { %p1686_p7 = pneg %p1685_p5  ;;  %p1692_p2 = por %p1691_p1, %p1690_p12 }
  0x85   : > { %p1693_p13 = pnand %p1692_p2, %p1686_p7 }
  0x87   : > { %1696 = shalt.err (!%p1693_p13)
}
  0x88   : > { %1380 = dma.hbm_to_vmem [thread:$0]  (!%p1995_p11), %s1991_s13, 2048, %s1993_s8, %s1999_s6, %s1776_s23, %s1776_s23, %s1777_s27  }
  0x89   : > { %p2254_p9 = scmp.ne.s32.totalorder %s2248_s26, 0 }
  0x8a   : > { %s2033_s28 = sand.u32 (!%p2254_p9), 1, %s1763_s19   ;;  %p2255_p0 = scmp.ne.s32.totalorder (!%p2254_p9), %s2246_s24, 0 }
  0x8b   : > { %249 = sbr.rel (%p2254_p9) target bundleno = 729 (0x2d9), region = 40  ;;  %s1248_s30 = sshll.u32 (!%p2254_p9), %s2033_s28, 7 }
  0x8c   : > { %s252_s11 = scalar_lea.sflag (!%p2254_p9), [#allocation3], %s2033_s28  ;;  %s2037_s12 = scalar_lea.vmem (!%p2254_p9), [#allocation2], %s1248_s30 }
  0x92   : > { %1742 = dma.done.wait (%p2255_p0), %s252_s11, 2048  }
  0x93   : > { %1744 = vsyncadd (%p2255_p0), %s252_s11, 4294965248  ;;  %p2256_p11 = scmp.eq.s32.totalorder %s1834_s22, 0 }
  0x95   : > { %1746 = dma.done.wait (%p2256_p11), [#allocation6], 4128   ;;  %p2257_p6 = pmov %p2256_p11 }
  0x97   : > { %1748 = vsyncadd (%p2257_p6), [#allocation6], 4294963168  ;;  %p2258_p4 = pmov %p2257_p6 }
  0x99   : > { %1750 = dma.done.wait (%p2258_p4), [#allocation9], 4128   ;;  %p2259_p8 = pmov %p2258_p4 }
  0x9a   : > { %v1435_v0 = vld [vmem:[#allocation5 + $0x4] ss:$8 sps:$4 sm:$0xff]   ;;  %v1437_v1 = vld [vmem:[#allocation5] ss:$8 sps:$4 sm:$0xff]   ;;  %v1438_v2 = vld [vmem:[#allocation5 + $0x14] ss:$8 sps:$4 sm:$0xff]  }
  0x9b   : > { %1752 = vsyncadd (%p2259_p8), [#allocation9], 4294963168  ;;  %600 = vmatprep.subr.bf16.mxu0 %v1435_v0  ;;  %v1440_v3 = vld [vmem:[#allocation5 + $0x10] ss:$8 sps:$4 sm:$0xff]   ;;  %v1441_v4 = vld [vmem:[#allocation5 + $0x24] ss:$8 sps:$4 sm:$0xff]  }
  0x9c   : > { %601 = vmatpush1.bf16.msra.mxu0 %v1437_v1  ;;  %v1443_v5 = vld [vmem:[#allocation5 + $0x20] ss:$8 sps:$4 sm:$0xff]   ;;  %v1444_v6 = vld [vmem:[#allocation5 + $0x34] ss:$8 sps:$4 sm:$0xff]   ;;  %v1446_v7 = vld [vmem:[#allocation5 + $0x30] ss:$8 sps:$4 sm:$0xff]  }
  0x9d   : > { %602 = vmatprep.subr.bf16.mxu0 %v1438_v2  ;;  %v1447_v8 = vld [vmem:[#allocation5 + $0x44] ss:$8 sps:$4 sm:$0xff]   ;;  %v1449_v9 = vld [vmem:[#allocation5 + $0x40] ss:$8 sps:$4 sm:$0xff]   ;;  %v1450_v10 = vld [vmem:[#allocation5 + $0x54] ss:$8 sps:$4 sm:$0xff]  }
  0x9e   : > { %v1452_v11 = vld [vmem:[#allocation5 + $0x50] ss:$8 sps:$4 sm:$0xff]   ;;  %v1453_v12 = vld [vmem:[#allocation5 + $0x64] ss:$8 sps:$4 sm:$0xff]   ;;  %v1455_v14 = vld [vmem:[#allocation5 + $0x60] ss:$8 sps:$4 sm:$0xff]  }
  0x9f   : > { %v1485_v13 = vld [vmem:[%s2037_s12 + $0x4] ss:$8 sps:$4 sm:$0xff]   ;;  %v1456_v15 = vld [vmem:[#allocation5 + $0x74] ss:$8 sps:$4 sm:$0xff]   ;;  %v1458_v16 = vld [vmem:[#allocation5 + $0x70] ss:$8 sps:$4 sm:$0xff]  }
  0xa0   : > { %603 = vmatpush1.bf16.msra.mxu0 %v1440_v3  ;;  %632 = vmatprep.mubr.bf16.mxu0 %v1485_v13  ;;  %v1459_v17 = vld [vmem:[#allocation5 + $0x84] ss:$8 sps:$4 sm:$0xff]   ;;  %v1461_v18 = vld [vmem:[#allocation5 + $0x80] ss:$8 sps:$4 sm:$0xff]   ;;  %v1462_v19 = vld [vmem:[#allocation5 + $0x94] ss:$8 sps:$4 sm:$0xff]  }
  0xa1   : > { %604 = vmatprep.subr.bf16.mxu0 %v1441_v4  ;;  %v1507_v20 = vld [vmem:[#allocation8 + $0x4] ss:$8 sps:$4 sm:$0xff]   ;;  %v1509_v21 = vld [vmem:[#allocation8] ss:$8 sps:$4 sm:$0xff]   ;;  %v1510_v23 = vld [vmem:[#allocation8 + $0x14] ss:$8 sps:$4 sm:$0xff]  }
  0xa2   : > { %v1464_v22 = vld [vmem:[#allocation5 + $0x90] ss:$8 sps:$4 sm:$0xff]   ;;  %965 = vmatprep.subr.bf16.mxu1 %v1507_v20  ;;  %v1465_v24 = vld [vmem:[#allocation5 + $0xa4] ss:$8 sps:$4 sm:$0xff]   ;;  %v1467_v27 = vld [vmem:[#allocation5 + $0xa0] ss:$8 sps:$4 sm:$0xff]  }
  0xa3   : > { %966 = vmatpush1.bf16.msra.mxu1 %v1509_v21  ;;  %v1512_v25 = vld [vmem:[#allocation8 + $0x10] ss:$8 sps:$4 sm:$0xff]   ;;  %v1513_v26 = vld [vmem:[#allocation8 + $0x24] ss:$8 sps:$4 sm:$0xff]   ;;  %v1515_v29 = vld [vmem:[#allocation8 + $0x20] ss:$8 sps:$4 sm:$0xff]  }
  0xa4   : > { %605 = vmatpush1.bf16.msra.mxu0 %v1443_v5  ;;  %967 = vmatprep.subr.bf16.mxu1 %v1510_v23  ;;  %v1468_v28 = vld [vmem:[#allocation5 + $0xb4] ss:$8 sps:$4 sm:$0xff]   ;;  %v1470_v31 = vld [vmem:[#allocation5 + $0xb0] ss:$8 sps:$4 sm:$0xff]   ;;  %v1471_v32 = vld [vmem:[#allocation5 + $0xc4] ss:$8 sps:$4 sm:$0xff]  }
  0xa5   : > { %606 = vmatprep.subr.bf16.mxu0 %v1444_v6  ;;  %v1516_v30 = vld [vmem:[#allocation8 + $0x34] ss:$8 sps:$4 sm:$0xff]   ;;  %v1518_v33 = vld [vmem:[#allocation8 + $0x30] ss:$8 sps:$4 sm:$0xff]   ;;  %v1519_v34 = vld [vmem:[#allocation8 + $0x44] ss:$8 sps:$4 sm:$0xff]  }
  0xa6   : > { %v1473_v35 = vld [vmem:[#allocation5 + $0xc0] ss:$8 sps:$4 sm:$0xff]   ;;  %v1474_v36 = vld [vmem:[#allocation5 + $0xd4] ss:$8 sps:$4 sm:$0xff]   ;;  %v1476_v39 = vld [vmem:[#allocation5 + $0xd0] ss:$8 sps:$4 sm:$0xff]  }
  0xa7   : > { %968 = vmatpush1.bf16.msra.mxu1 %v1512_v25  ;;  %v1521_v37 = vld [vmem:[#allocation8 + $0x40] ss:$8 sps:$4 sm:$0xff]   ;;  %v1522_v38 = vld [vmem:[#allocation8 + $0x54] ss:$8 sps:$4 sm:$0xff]   ;;  %v1524_v40 = vld [vmem:[#allocation8 + $0x50] ss:$8 sps:$4 sm:$0xff]  }
  0xa8   : > { %607 = vmatpush1.bf16.msra.mxu0 %v1446_v7  ;;  %969 = vmatprep.subr.bf16.mxu1 %v1513_v26  ;;  %v1477_v41 = vld [vmem:[#allocation5 + $0xe4] ss:$8 sps:$4 sm:$0xff]   ;;  %v1479_v43 = vld [vmem:[#allocation5 + $0xe0] ss:$8 sps:$4 sm:$0xff]   ;;  %v1480_v45 = vld [vmem:[#allocation5 + $0xf4] ss:$8 sps:$4 sm:$0xff]  }
  0xa9   : > { %608 = vmatprep.subr.bf16.mxu0 %v1447_v8  ;;  %v1525_v42 = vld [vmem:[#allocation8 + $0x64] ss:$8 sps:$4 sm:$0xff]   ;;  %v1527_v44 = vld [vmem:[#allocation8 + $0x60] ss:$8 sps:$4 sm:$0xff]   ;;  %v1528_v46 = vld [vmem:[#allocation8 + $0x74] ss:$8 sps:$4 sm:$0xff]  }
  0xaa   : > { %v1482_v47 = vld [vmem:[#allocation5 + $0xf0] ss:$8 sps:$4 sm:$0xff]   ;;  %v1483_v50 = vld [vmem:[%s2037_s12] ss:$8 sps:$4 sm:$0xff]   ;;  %v1486_v51 = vld [vmem:[%s2037_s12 + $0x14] ss:$8 sps:$4 sm:$0xff]  }
  0xab   : > { %970 = vmatpush1.bf16.msra.mxu1 %v1515_v29  ;;  %v1530_v48 = vld [vmem:[#allocation8 + $0x70] ss:$8 sps:$4 sm:$0xff]   ;;  %v1531_v49 = vld [vmem:[#allocation8 + $0x84] ss:$8 sps:$4 sm:$0xff]   ;;  %v1533_v52 = vld [vmem:[#allocation8 + $0x80] ss:$8 sps:$4 sm:$0xff]  }
  0xac   : > { %609 = vmatpush1.bf16.msra.mxu0 %v1449_v9  ;;  %971 = vmatprep.subr.bf16.mxu1 %v1516_v30  ;;  %v1534_v53 = vld [vmem:[#allocation8 + $0x94] ss:$8 sps:$4 sm:$0xff]   ;;  %v1536_v54 = vld [vmem:[#allocation8 + $0x90] ss:$8 sps:$4 sm:$0xff]   ;;  %v1537_v55 = vld [vmem:[#allocation8 + $0xa4] ss:$8 sps:$4 sm:$0xff]  }
  0xad   : > { %610 = vmatprep.subr.bf16.mxu0 %v1450_v10  ;;  %v1488_v56 = vld [vmem:[%s2037_s12 + $0x10] ss:$8 sps:$4 sm:$0xff]   ;;  %v1489_v57 = vld [vmem:[%s2037_s12 + $0x24] ss:$8 sps:$4 sm:$0xff]   ;;  %v1491_v62 = vld [vmem:[%s2037_s12 + $0x20] ss:$8 sps:$4 sm:$0xff]  }
  0xae   : > { %v1539_v58 = vld [vmem:[#allocation8 + $0xa0] ss:$8 sps:$4 sm:$0xff]   ;;  %v1540_v59 = vld [vmem:[#allocation8 + $0xb4] ss:$8 sps:$4 sm:$0xff]   ;;  %v1542_v60 = vld [vmem:[#allocation8 + $0xb0] ss:$8 sps:$4 sm:$0xff]  }
  0xaf   : > { %972 = vmatpush1.bf16.msra.mxu1 %v1518_v33  ;;  %v1543_v61 = vld [vmem:[#allocation8 + $0xc4] ss:$8 sps:$4 sm:$0xff]   ;;  %v1492_v63 = vld [vmem:[%s2037_s12 + $0x34] ss:$8 sps:$4 sm:$0xff]   ;;  %v1545_v0 = vld [vmem:[#allocation8 + $0xc0] ss:$8 sps:$4 sm:$0xff]  }
  0xb0   : > { %611 = vmatpush1.bf16.msra.mxu0 %v1452_v11  ;;  %973 = vmatprep.subr.bf16.mxu1 %v1519_v34  ;;  %v1546_v1 = vld [vmem:[#allocation8 + $0xd4] ss:$8 sps:$4 sm:$0xff]   ;;  %v1495_v3 = vld [vmem:[%s2037_s12 + $0x44] ss:$8 sps:$4 sm:$0xff]   ;;  %v1548_v11 = vld [vmem:[#allocation8 + $0xd0] ss:$8 sps:$4 sm:$0xff]  }
  0xb1   : > { %612 = vmatprep.subr.bf16.mxu0 %v1453_v12  ;;  %v1494_v2 = vld [vmem:[%s2037_s12 + $0x30] ss:$8 sps:$4 sm:$0xff]   ;;  %v1497_v4 = vld [vmem:[%s2037_s12 + $0x40] ss:$8 sps:$4 sm:$0xff]   ;;  %v1498_v5 = vld [vmem:[%s2037_s12 + $0x54] ss:$8 sps:$4 sm:$0xff]  }
  0xb2   : > { %v1500_v6 = vld [vmem:[%s2037_s12 + $0x50] ss:$8 sps:$4 sm:$0xff]   ;;  %v1501_v7 = vld [vmem:[%s2037_s12 + $0x64] ss:$8 sps:$4 sm:$0xff]   ;;  %v1503_v8 = vld [vmem:[%s2037_s12 + $0x60] ss:$8 sps:$4 sm:$0xff]  }
  0xb3   : > { %974 = vmatpush1.bf16.msra.mxu1 %v1521_v37  ;;  %v1504_v9 = vld [vmem:[%s2037_s12 + $0x74] ss:$8 sps:$4 sm:$0xff]   ;;  %v1506_v10 = vld [vmem:[%s2037_s12 + $0x70] ss:$8 sps:$4 sm:$0xff]   ;;  %v1551_v13 = vld [vmem:[#allocation8 + $0xe0] ss:$8 sps:$4 sm:$0xff]  }
  0xb4   : > { %613 = vmatpush1.bf16.msra.mxu0 %v1455_v14  ;;  %975 = vmatprep.subr.bf16.mxu1 %v1522_v38  ;;  %v1549_v12 = vld [vmem:[#allocation8 + $0xe4] ss:$8 sps:$4 sm:$0xff]   ;;  %v1552_v14 = vld [vmem:[#allocation8 + $0xf4] ss:$8 sps:$4 sm:$0xff]   ;;  %s1253_s24 = sshll.u32 %s2033_s28, 8  ;;  %s1343_s23 = sshll.u32 %s1834_s22, 12 }
  0xb5   : > { %614 = vmatprep.subr.bf16.mxu0 %v1456_v15  ;;  %v1554_v15 = vld [vmem:[#allocation8 + $0xf0] ss:$8 sps:$4 sm:$0xff]   ;;  %s2122_s26 = scalar_lea.vmem [#allocation11], %s1253_s24  ;;  %s2187_s16 = scalar_lea.hbm %s2242_s5, %s1343_s23 }
  0xb6   : > { %s1125_s27 = sshll.u32 %s2122_s26, 4  ;;  %s1111_s22 = scalar_lea.sflag [#allocation4], %s2033_s28  ;;  %s2189_s27 = int_to_ptr.vmem [resolvable:$true] %s1125_s27 }
  0xb7   : > { %976 = vmatpush1.bf16.msra.mxu1 %v1524_v40  ;;  %s1697_s6 = scalar_lea.vmem %s2189_s27, 4096  ;;  %s1780_s9 = smov [#allocation11]  }
  0xb8   : > { %615 = vmatpush1.bf16.msra.mxu0 %v1458_v16  ;;  %977 = vmatprep.subr.bf16.mxu1 %v1525_v42  ;;  %v350_v16 = vlaneseq  ;;  %p1698_p3 = scmp.ne.s32.totalorder %s2189_s27, %s1697_s6  ;;  %s1701_s15 = sshll.u32 %s1780_s9, 4  ;;  %s1702_s15 = int_to_ptr.vmem [resolvable:$false] %s1701_s15 }
  0xb9   : > { %616 = vmatprep.subr.bf16.mxu0 %v1459_v17  ;;  %s1703_s29 = scalar_lea.vmem %s1702_s15, 8192  ;;  %p1704_p12 = scmp.lt.s32.totalorder %s2189_s27, %s1702_s15 }
  0xba   : > { %v2067_v17 = vshrl.u32 %v350_v16, 7  ;;  %p1699_p5 = pnand %p1698_p3, %p1978_p10  ;;  %p1705_p1 = scmp.lt.s32.totalorder %s1703_s29, %s1697_s6 }
  0xbb   : > { %978 = vmatpush1.bf16.msra.mxu1 %v1527_v44 }
  0xbc   : > { %617 = vmatpush1.bf16.msra.mxu0 %v1461_v18  ;;  %979 = vmatprep.subr.bf16.mxu1 %v1528_v46  ;;  %v352_v18 = vsub.s32 0, %v2067_v17  ;;  %v356_v20 = vsub.s32 1, %v2067_v17  ;;  %p1700_p7 = pneg %p1699_p5  ;;  %p1706_p2 = por %p1705_p1, %p1704_p12 }
  0xbd   : > { %618 = vmatprep.subr.bf16.mxu0 %v1462_v19  ;;  %v348_v19 = vld [vmem:[#allocation7] sm:$0x3] }
  0xbe   : > { %v2073_v21 = vrot.slane %v348_v19, %v352_v18  ;;  %p1707_p13 = pnand %p1706_p2, %p1700_p7 }
  0xbf   : > { %980 = vmatpush1.bf16.msra.mxu1 %v1530_v48 }
  0xc0   : > { %619 = vmatpush1.bf16.msra.mxu0 %v1464_v22  ;;  %981 = vmatprep.subr.bf16.mxu1 %v1531_v49  ;;  %v2077_v22 = vrot.slane %v348_v19, %v356_v20 }
  0xc1   : > { %620 = vmatprep.subr.bf16.mxu0 %v1465_v24 }
  0xc3   : > { %982 = vmatpush1.bf16.msra.mxu1 %v1533_v52 }
  0xc4   : > { %621 = vmatpush1.bf16.msra.mxu0 %v1467_v27  ;;  %983 = vmatprep.subr.bf16.mxu1 %v1534_v53 }
  0xc5   : > { %622 = vmatprep.subr.bf16.mxu0 %v1468_v28 }
  0xc7   : > { %984 = vmatpush1.bf16.msra.mxu1 %v1536_v54 }
  0xc8   : > { %623 = vmatpush1.bf16.msra.mxu0 %v1470_v31  ;;  %985 = vmatprep.subr.bf16.mxu1 %v1537_v55 }
  0xc9   : > { %624 = vmatprep.subr.bf16.mxu0 %v1471_v32 }
  0xcb   : > { %986 = vmatpush1.bf16.msra.mxu1 %v1539_v58 }
  0xcc   : > { %625 = vmatpush1.bf16.msra.mxu0 %v1473_v35  ;;  %987 = vmatprep.subr.bf16.mxu1 %v1540_v59 }
  0xcd   : > { %626 = vmatprep.subr.bf16.mxu0 %v1474_v36 }
  0xcf   : > { %988 = vmatpush1.bf16.msra.mxu1 %v1542_v60 }
  0xd0   : > { %627 = vmatpush1.bf16.msra.mxu0 %v1476_v39  ;;  %989 = vmatprep.subr.bf16.mxu1 %v1543_v61 }
  0xd1   : > { %628 = vmatprep.subr.bf16.mxu0 %v1477_v41 }
  0xd3   : > { %990 = vmatpush1.bf16.msra.mxu1 %v1545_v0 }
  0xd4   : > { %629 = vmatpush1.bf16.msra.mxu0 %v1479_v43  ;;  %991 = vmatprep.subr.bf16.mxu1 %v1546_v1 }
  0xd5   : > { %630 = vmatprep.subr.bf16.mxu0 %v1480_v45 }
  0xd7   : > { %992 = vmatpush1.bf16.msra.mxu1 %v1548_v11 }
  0xd8   : > { %631 = vmatpush1.bf16.msra.mxu0 %v1482_v47  ;;  %993 = vmatprep.subr.bf16.mxu1 %v1549_v12 }
  0xdb   : > { %633 = vmatmul.mubr.bf16.vlgmr.msra.gmra.mrb[0].mxu0 %v1483_v50  ;;  %994 = vmatpush1.bf16.msra.mxu1 %v1551_v13 }
  0xdc   : > { %642 = vmatprep.mubr.bf16.mxu0 %v1486_v51  ;;  %995 = vmatprep.subr.bf16.mxu1 %v1552_v14 }
  0xdf   : > { %996 = vmatpush1.bf16.msra.mxu1 %v1554_v15 }
  0xe3   : > { %643 = vmatmul.mubr.bf16.gmra.mrb[4].mxu0 %v1488_v56 }
  0xe4   : > { %652 = vmatprep.mubr.bf16.mxu0 %v1489_v57 }
  0xeb   : > { %653 = vmatmul.mubr.bf16.gmra.mrb[8].mxu0 %v1491_v62 }
  0xec   : > { %662 = vmatprep.mubr.bf16.mxu0 %v1492_v63 }
  0xf3   : > { %663 = vmatmul.mubr.bf16.gmra.mrb[12].mxu0 %v1494_v2 }
  0xf4   : > { %672 = vmatprep.mubr.bf16.mxu0 %v1495_v3 }
  0xfb   : > { %673 = vmatmul.mubr.bf16.gmra.mrb[16].mxu0 %v1497_v4 }
  0xfc   : > { %682 = vmatprep.mubr.bf16.mxu0 %v1498_v5 }
 0x103   : > { %683 = vmatmul.mubr.bf16.gmra.mrb[20].mxu0 %v1500_v6 }
 0x104   : > { %692 = vmatprep.mubr.bf16.mxu0 %v1501_v7 }
 0x10b   : > { %693 = vmatmul.mubr.bf16.gmra.mrb[24].mxu0 %v1503_v8 }
 0x10c   : > { %702 = vmatprep.mubr.bf16.mxu0 %v1504_v9 }
 0x113   : > { %703 = vmatmul.mubr.bf16.gmra.mrb[28].mxu0 %v1506_v10 }
 0x1ae   : > { %v634_v23 = vpop.f32.mrb[0].mxu0 }
 0x1af   : > { %v635_v24 = vadd.f32 %v634_v23, %v2073_v21  ;;  %v636_v25 = vpop.f32.mrb[1].mxu0 }
 0x1b0   : > { %v637_v26 = vadd.f32 %v636_v25, %v2077_v22  ;;  %v638_v27 = vpop.f32.mrb[2].mxu0 }
 0x1b1   : > { %v639_v28 = vadd.f32 %v638_v27, %v2073_v21  ;;  %v640_v29 = vpop.f32.mrb[3].mxu0  ;;  %v713_v31 = vmax.f32 %v635_v24, 0.0 }
 0x1b2   : > { %v641_v30 = vadd.f32 %v640_v29, %v2077_v22  ;;  %v714_v33 = vmax.f32 %v637_v26, 0.0 }
 0x1b3   : > { %v715_v32 = vmax.f32 %v639_v28, 0.0 }
 0x1b4   : > { %v716_v34 = vmax.f32 %v641_v30, 0.0 }
 0x1b5   : > { %v745_v35 = vpack.c.bf16 %v715_v32, %v713_v31 }
 0x1b6   : > { %v644_v36 = vpop.f32.mrb[4].mxu0  ;;  %v746_v37 = vpack.c.bf16 %v716_v34, %v714_v33 }
 0x1b7   : > { %v645_v38 = vadd.f32 %v644_v36, %v2073_v21  ;;  %v646_v39 = vpop.f32.mrb[5].mxu0 }
 0x1b8   : > { %v647_v40 = vadd.f32 %v646_v39, %v2077_v22  ;;  %v648_v41 = vpop.f32.mrb[6].mxu0  ;;  %997 = vmatprep.mubr.bf16.mxu1 %v746_v37 }
 0x1b9   : > { %v649_v42 = vadd.f32 %v648_v41, %v2073_v21  ;;  %v650_v43 = vpop.f32.mrb[7].mxu0  ;;  %998 = vmatmul.mubr.bf16.vlgmr.msra.gmra.mrb[0].mxu1 %v745_v35  ;;  %v717_v45 = vmax.f32 %v645_v38, 0.0 }
 0x1ba   : > { %v651_v44 = vadd.f32 %v650_v43, %v2077_v22  ;;  %v718_v47 = vmax.f32 %v647_v40, 0.0 }
 0x1bb   : > { %v719_v46 = vmax.f32 %v649_v42, 0.0 }
 0x1bc   : > { %v720_v48 = vmax.f32 %v651_v44, 0.0 }
 0x1bd   : > { %v747_v49 = vpack.c.bf16 %v719_v46, %v717_v45 }
 0x1be   : > { %v748_v50 = vpack.c.bf16 %v720_v48, %v718_v47  ;;  %v654_v51 = vpop.f32.mrb[8].mxu0 }
 0x1bf   : > { %v655_v52 = vadd.f32 %v654_v51, %v2073_v21  ;;  %v656_v53 = vpop.f32.mrb[9].mxu0 }
 0x1c0   : > { %v657_v54 = vadd.f32 %v656_v53, %v2077_v22  ;;  %v658_v55 = vpop.f32.mrb[10].mxu0  ;;  %1007 = vmatprep.mubr.bf16.mxu1 %v748_v50 }
 0x1c1   : > { %v659_v56 = vadd.f32 %v658_v55, %v2073_v21  ;;  %v660_v57 = vpop.f32.mrb[11].mxu0  ;;  %1008 = vmatmul.mubr.bf16.gmra.mrb[4].mxu1 %v747_v49  ;;  %v721_v59 = vmax.f32 %v655_v52, 0.0 }
 0x1c2   : > { %v661_v58 = vadd.f32 %v660_v57, %v2077_v22  ;;  %v722_v61 = vmax.f32 %v657_v54, 0.0 }
 0x1c3   : > { %v723_v60 = vmax.f32 %v659_v56, 0.0 }
 0x1c4   : > { %v724_v62 = vmax.f32 %v661_v58, 0.0 }
 0x1c5   : > { %v749_v63 = vpack.c.bf16 %v723_v60, %v721_v59 }
 0x1c6   : > { %v750_v0 = vpack.c.bf16 %v724_v62, %v722_v61  ;;  %v664_v1 = vpop.f32.mrb[12].mxu0 }
 0x1c7   : > { %v665_v2 = vadd.f32 %v664_v1, %v2073_v21  ;;  %v666_v3 = vpop.f32.mrb[13].mxu0 }
 0x1c8   : > { %v667_v4 = vadd.f32 %v666_v3, %v2077_v22  ;;  %v668_v5 = vpop.f32.mrb[14].mxu0  ;;  %1017 = vmatprep.mubr.bf16.mxu1 %v750_v0 }
 0x1c9   : > { %v669_v6 = vadd.f32 %v668_v5, %v2073_v21  ;;  %v670_v7 = vpop.f32.mrb[15].mxu0  ;;  %1018 = vmatmul.mubr.bf16.gmra.mrb[8].mxu1 %v749_v63  ;;  %v725_v9 = vmax.f32 %v665_v2, 0.0 }
 0x1ca   : > { %v671_v8 = vadd.f32 %v670_v7, %v2077_v22  ;;  %v726_v11 = vmax.f32 %v667_v4, 0.0 }
 0x1cb   : > { %v727_v10 = vmax.f32 %v669_v6, 0.0 }
 0x1cc   : > { %v728_v12 = vmax.f32 %v671_v8, 0.0 }
 0x1cd   : > { %v751_v13 = vpack.c.bf16 %v727_v10, %v725_v9 }
 0x1ce   : > { %v752_v14 = vpack.c.bf16 %v728_v12, %v726_v11  ;;  %v674_v15 = vpop.f32.mrb[16].mxu0  ;;  %v793_v12 = vld [vmem:[#allocation10] sm:$0x3] }
 0x1cf   : > { %v675_v16 = vadd.f32 %v674_v15, %v2073_v21  ;;  %v676_v19 = vpop.f32.mrb[17].mxu0 }
 0x1d0   : > { %v677_v23 = vadd.f32 %v676_v19, %v2077_v22  ;;  %v678_v24 = vpop.f32.mrb[18].mxu0  ;;  %1027 = vmatprep.mubr.bf16.mxu1 %v752_v14 }
 0x1d1   : > { %v679_v25 = vadd.f32 %v678_v24, %v2073_v21  ;;  %v680_v26 = vpop.f32.mrb[19].mxu0  ;;  %1028 = vmatmul.mubr.bf16.gmra.mrb[12].mxu1 %v751_v13  ;;  %v729_v28 = vmax.f32 %v675_v16, 0.0  ;;  %v2114_v13 = vrot.slane %v793_v12, %v352_v18 }
 0x1d2   : > { %v681_v27 = vadd.f32 %v680_v26, %v2077_v22  ;;  %v730_v30 = vmax.f32 %v677_v23, 0.0 }
 0x1d3   : > { %v731_v29 = vmax.f32 %v679_v25, 0.0 }
 0x1d4   : > { %v732_v31 = vmax.f32 %v681_v27, 0.0 }
 0x1d5   : > { %v753_v32 = vpack.c.bf16 %v731_v29, %v729_v28 }
 0x1d6   : > { %v754_v33 = vpack.c.bf16 %v732_v31, %v730_v30  ;;  %v684_v34 = vpop.f32.mrb[20].mxu0 }
 0x1d7   : > { %v685_v35 = vadd.f32 %v684_v34, %v2073_v21  ;;  %v686_v36 = vpop.f32.mrb[21].mxu0 }
 0x1d8   : > { %v687_v37 = vadd.f32 %v686_v36, %v2077_v22  ;;  %v688_v38 = vpop.f32.mrb[22].mxu0  ;;  %1037 = vmatprep.mubr.bf16.mxu1 %v754_v33 }
 0x1d9   : > { %v689_v39 = vadd.f32 %v688_v38, %v2073_v21  ;;  %v690_v40 = vpop.f32.mrb[23].mxu0  ;;  %1038 = vmatmul.mubr.bf16.gmra.mrb[16].mxu1 %v753_v32  ;;  %v733_v42 = vmax.f32 %v685_v35, 0.0 }
 0x1da   : > { %v691_v41 = vadd.f32 %v690_v40, %v2077_v22  ;;  %v734_v44 = vmax.f32 %v687_v37, 0.0 }
 0x1db   : > { %v735_v43 = vmax.f32 %v689_v39, 0.0 }
 0x1dc   : > { %v736_v45 = vmax.f32 %v691_v41, 0.0 }
 0x1dd   : > { %v755_v46 = vpack.c.bf16 %v735_v43, %v733_v42 }
 0x1de   : > { %v756_v47 = vpack.c.bf16 %v736_v45, %v734_v44  ;;  %v694_v48 = vpop.f32.mrb[24].mxu0 }
 0x1df   : > { %v695_v49 = vadd.f32 %v694_v48, %v2073_v21  ;;  %v696_v50 = vpop.f32.mrb[25].mxu0 }
 0x1e0   : > { %v697_v51 = vadd.f32 %v696_v50, %v2077_v22  ;;  %v698_v52 = vpop.f32.mrb[26].mxu0  ;;  %1047 = vmatprep.mubr.bf16.mxu1 %v756_v47 }
 0x1e1   : > { %v699_v53 = vadd.f32 %v698_v52, %v2073_v21  ;;  %v700_v54 = vpop.f32.mrb[27].mxu0  ;;  %1048 = vmatmul.mubr.bf16.gmra.mrb[20].mxu1 %v755_v46  ;;  %v737_v56 = vmax.f32 %v695_v49, 0.0 }
 0x1e2   : > { %v701_v55 = vadd.f32 %v700_v54, %v2077_v22  ;;  %v738_v58 = vmax.f32 %v697_v51, 0.0 }
 0x1e3   : > { %v739_v57 = vmax.f32 %v699_v53, 0.0 }
 0x1e4   : > { %v740_v59 = vmax.f32 %v701_v55, 0.0 }
 0x1e5   : > { %v757_v60 = vpack.c.bf16 %v739_v57, %v737_v56 }
 0x1e6   : > { %v758_v61 = vpack.c.bf16 %v740_v59, %v738_v58  ;;  %v704_v62 = vpop.f32.mrb[28].mxu0 }
 0x1e7   : > { %v705_v63 = vadd.f32 %v704_v62, %v2073_v21  ;;  %v706_v0 = vpop.f32.mrb[29].mxu0 }
 0x1e8   : > { %v707_v1 = vadd.f32 %v706_v0, %v2077_v22  ;;  %v708_v2 = vpop.f32.mrb[30].mxu0  ;;  %1057 = vmatprep.mubr.bf16.mxu1 %v758_v61 }
 0x1e9   : > { %v709_v3 = vadd.f32 %v708_v2, %v2073_v21  ;;  %v710_v4 = vpop.f32.mrb[31].mxu0  ;;  %1058 = vmatmul.mubr.bf16.gmra.mrb[24].mxu1 %v757_v60  ;;  %v741_v6 = vmax.f32 %v705_v63, 0.0  ;;  %v2118_v21 = vrot.slane %v793_v12, %v356_v20 }
 0x1ea   : > { %v711_v5 = vadd.f32 %v710_v4, %v2077_v22  ;;  %v742_v8 = vmax.f32 %v707_v1, 0.0 }
 0x1eb   : > { %v743_v7 = vmax.f32 %v709_v3, 0.0 }
 0x1ec   : > { %v744_v9 = vmax.f32 %v711_v5, 0.0 }
 0x1ed   : > { %v759_v10 = vpack.c.bf16 %v743_v7, %v741_v6 }
 0x1ee   : > { %v760_v11 = vpack.c.bf16 %v744_v9, %v742_v8 }
 0x1f0   : > { %1067 = vmatprep.mubr.bf16.mxu1 %v760_v11 }
 0x1f1   : > { %1068 = vmatmul.mubr.bf16.gmra.mrb[28].mxu1 %v759_v10 }
 0x28c   : > { %v999_v14 = vpop.f32.mrb[0].mxu1 }
 0x28d   : > { %v1000_v22 = vadd.f32 %v999_v14, %v2114_v13  ;;  %v1001_v15 = vpop.f32.mrb[1].mxu1 }
 0x28e   : > { %v1002_v16 = vadd.f32 %v1001_v15, %v2118_v21  ;;  %v1003_v19 = vpop.f32.mrb[2].mxu1 }
 0x28f   : > { %1078 = vst [vmem:[%s2122_s26] sm:$0xff] %v1000_v22  ;;  %v1004_v17 = vadd.f32 %v1003_v19, %v2114_v13  ;;  %v1005_v18 = vpop.f32.mrb[3].mxu1 }
 0x290   : > { %1079 = vst [vmem:[%s2122_s26 + $0x8] sm:$0xff] %v1002_v16  ;;  %v1006_v20 = vadd.f32 %v1005_v18, %v2118_v21 }
 0x291   : > { %1080 = vst [vmem:[%s2122_s26 + $0x10] sm:$0xff] %v1004_v17 }
 0x292   : > { %1081 = vst [vmem:[%s2122_s26 + $0x18] sm:$0xff] %v1006_v20 }
 0x294   : > { %v1009_v23 = vpop.f32.mrb[4].mxu1 }
 0x295   : > { %v1010_v24 = vadd.f32 %v1009_v23, %v2114_v13  ;;  %v1011_v25 = vpop.f32.mrb[5].mxu1 }
 0x296   : > { %v1012_v26 = vadd.f32 %v1011_v25, %v2118_v21  ;;  %v1013_v27 = vpop.f32.mrb[6].mxu1 }
 0x297   : > { %1082 = vst [vmem:[%s2122_s26 + $0x20] sm:$0xff] %v1010_v24  ;;  %v1014_v28 = vadd.f32 %v1013_v27, %v2114_v13  ;;  %v1015_v29 = vpop.f32.mrb[7].mxu1 }
 0x298   : > { %1083 = vst [vmem:[%s2122_s26 + $0x28] sm:$0xff] %v1012_v26  ;;  %v1016_v30 = vadd.f32 %v1015_v29, %v2118_v21 }
 0x299   : > { %1084 = vst [vmem:[%s2122_s26 + $0x30] sm:$0xff] %v1014_v28 }
 0x29a   : > { %1085 = vst [vmem:[%s2122_s26 + $0x38] sm:$0xff] %v1016_v30 }
 0x29c   : > { %v1019_v31 = vpop.f32.mrb[8].mxu1 }
 0x29d   : > { %v1020_v32 = vadd.f32 %v1019_v31, %v2114_v13  ;;  %v1021_v33 = vpop.f32.mrb[9].mxu1 }
 0x29e   : > { %v1022_v34 = vadd.f32 %v1021_v33, %v2118_v21  ;;  %v1023_v35 = vpop.f32.mrb[10].mxu1 }
 0x29f   : > { %1086 = vst [vmem:[%s2122_s26 + $0x40] sm:$0xff] %v1020_v32  ;;  %v1024_v36 = vadd.f32 %v1023_v35, %v2114_v13  ;;  %v1025_v37 = vpop.f32.mrb[11].mxu1 }
 0x2a0   : > { %1087 = vst [vmem:[%s2122_s26 + $0x48] sm:$0xff] %v1022_v34  ;;  %v1026_v38 = vadd.f32 %v1025_v37, %v2118_v21 }
 0x2a1   : > { %1088 = vst [vmem:[%s2122_s26 + $0x50] sm:$0xff] %v1024_v36 }
 0x2a2   : > { %1089 = vst [vmem:[%s2122_s26 + $0x58] sm:$0xff] %v1026_v38 }
 0x2a4   : > { %v1029_v39 = vpop.f32.mrb[12].mxu1 }
 0x2a5   : > { %v1030_v40 = vadd.f32 %v1029_v39, %v2114_v13  ;;  %v1031_v41 = vpop.f32.mrb[13].mxu1 }
 0x2a6   : > { %v1032_v42 = vadd.f32 %v1031_v41, %v2118_v21  ;;  %v1033_v43 = vpop.f32.mrb[14].mxu1 }
 0x2a7   : > { %1090 = vst [vmem:[%s2122_s26 + $0x60] sm:$0xff] %v1030_v40  ;;  %v1034_v44 = vadd.f32 %v1033_v43, %v2114_v13  ;;  %v1035_v45 = vpop.f32.mrb[15].mxu1 }
 0x2a8   : > { %1091 = vst [vmem:[%s2122_s26 + $0x68] sm:$0xff] %v1032_v42  ;;  %v1036_v46 = vadd.f32 %v1035_v45, %v2118_v21 }
 0x2a9   : > { %1092 = vst [vmem:[%s2122_s26 + $0x70] sm:$0xff] %v1034_v44 }
 0x2aa   : > { %1093 = vst [vmem:[%s2122_s26 + $0x78] sm:$0xff] %v1036_v46 }
 0x2ac   : > { %v1039_v47 = vpop.f32.mrb[16].mxu1 }
 0x2ad   : > { %v1040_v48 = vadd.f32 %v1039_v47, %v2114_v13  ;;  %v1041_v49 = vpop.f32.mrb[17].mxu1 }
 0x2ae   : > { %v1042_v50 = vadd.f32 %v1041_v49, %v2118_v21  ;;  %v1043_v51 = vpop.f32.mrb[18].mxu1 }
 0x2af   : > { %1094 = vst [vmem:[%s2122_s26 + $0x80] sm:$0xff] %v1040_v48  ;;  %v1044_v52 = vadd.f32 %v1043_v51, %v2114_v13  ;;  %v1045_v53 = vpop.f32.mrb[19].mxu1 }
 0x2b0   : > { %1095 = vst [vmem:[%s2122_s26 + $0x88] sm:$0xff] %v1042_v50  ;;  %v1046_v54 = vadd.f32 %v1045_v53, %v2118_v21 }
 0x2b1   : > { %1096 = vst [vmem:[%s2122_s26 + $0x90] sm:$0xff] %v1044_v52 }
 0x2b2   : > { %1097 = vst [vmem:[%s2122_s26 + $0x98] sm:$0xff] %v1046_v54 }
 0x2b4   : > { %v1049_v55 = vpop.f32.mrb[20].mxu1 }
 0x2b5   : > { %v1050_v56 = vadd.f32 %v1049_v55, %v2114_v13  ;;  %v1051_v57 = vpop.f32.mrb[21].mxu1 }
 0x2b6   : > { %v1052_v58 = vadd.f32 %v1051_v57, %v2118_v21  ;;  %v1053_v59 = vpop.f32.mrb[22].mxu1 }
 0x2b7   : > { %1098 = vst [vmem:[%s2122_s26 + $0xa0] sm:$0xff] %v1050_v56  ;;  %v1054_v60 = vadd.f32 %v1053_v59, %v2114_v13  ;;  %v1055_v61 = vpop.f32.mrb[23].mxu1 }
 0x2b8   : > { %1099 = vst [vmem:[%s2122_s26 + $0xa8] sm:$0xff] %v1052_v58  ;;  %v1056_v62 = vadd.f32 %v1055_v61, %v2118_v21 }
 0x2b9   : > { %1100 = vst [vmem:[%s2122_s26 + $0xb0] sm:$0xff] %v1054_v60 }
 0x2ba   : > { %1101 = vst [vmem:[%s2122_s26 + $0xb8] sm:$0xff] %v1056_v62 }
 0x2bc   : > { %v1059_v63 = vpop.f32.mrb[24].mxu1 }
 0x2bd   : > { %v1060_v0 = vadd.f32 %v1059_v63, %v2114_v13  ;;  %v1061_v1 = vpop.f32.mrb[25].mxu1 }
 0x2be   : > { %v1062_v2 = vadd.f32 %v1061_v1, %v2118_v21  ;;  %v1063_v3 = vpop.f32.mrb[26].mxu1 }
 0x2bf   : > { %1102 = vst [vmem:[%s2122_s26 + $0xc0] sm:$0xff] %v1060_v0  ;;  %v1064_v4 = vadd.f32 %v1063_v3, %v2114_v13  ;;  %v1065_v5 = vpop.f32.mrb[27].mxu1 }
 0x2c0   : > { %1103 = vst [vmem:[%s2122_s26 + $0xc8] sm:$0xff] %v1062_v2  ;;  %v1066_v6 = vadd.f32 %v1065_v5, %v2118_v21 }
 0x2c1   : > { %1104 = vst [vmem:[%s2122_s26 + $0xd0] sm:$0xff] %v1064_v4 }
 0x2c2   : > { %1105 = vst [vmem:[%s2122_s26 + $0xd8] sm:$0xff] %v1066_v6 }
 0x2c4   : > { %v1069_v7 = vpop.f32.mrb[28].mxu1 }
 0x2c5   : > { %v1070_v8 = vadd.f32 %v1069_v7, %v2114_v13  ;;  %v1071_v9 = vpop.f32.mrb[29].mxu1 }
 0x2c6   : > { %v1072_v10 = vadd.f32 %v1071_v9, %v2118_v21  ;;  %v1073_v11 = vpop.f32.mrb[30].mxu1 }
 0x2c7   : > { %1106 = vst [vmem:[%s2122_s26 + $0xe0] sm:$0xff] %v1070_v8  ;;  %v1074_v12 = vadd.f32 %v1073_v11, %v2114_v13  ;;  %v1075_v14 = vpop.f32.mrb[31].mxu1 }
 0x2c8   : > { %1107 = vst [vmem:[%s2122_s26 + $0xe8] sm:$0xff] %v1072_v10  ;;  %v1076_v22 = vadd.f32 %v1075_v14, %v2118_v21 }
 0x2c9   : > { %1108 = vst [vmem:[%s2122_s26 + $0xf0] sm:$0xff] %v1074_v12 }
 0x2ca   : > { %1109 = vst [vmem:[%s2122_s26 + $0xf8] sm:$0xff] %v1076_v22 }
 0x2cb   : > { %1710 = shalt.err (!%p1707_p13)
}
 0x2cc   : > { %s1711_s10 = scalar_lea.hbm %s2187_s16, 4096  ;;  %s1715_s12 = scalar_lea.hbm %s2242_s5, 8192 }
 0x2cd   : > { %p1712_p9 = scmp.ne.s32.totalorder %s2187_s16, %s1711_s10  ;;  %p1716_p6 = scmp.lt.u32.totalorder %s2187_s16, %s2242_s5 }
 0x2ce   : > { %p1717_p4 = scmp.lt.u32.totalorder %s1715_s12, %s1711_s10  ;;  %p1719_p3 = scmp.lt.u32.totalorder %s1711_s10, %s2187_s16 }
 0x2cf   : > { %p1713_p0 = pnand %p1712_p9, %p1978_p10 }
 0x2d0   : > { %p1718_p8 = por %p1717_p4, %p1716_p6 }
 0x2d1   : > { %p1714_p11 = pneg %p1713_p0 }
 0x2d2   : > { %p1720_p5 = por %p1719_p3, %p1718_p8 }
 0x2d4   : > { %p1721_p7 = pnand %p1720_p5, %p1714_p11 }
 0x2d6   : > { %1724 = shalt.err (!%p1721_p7)
}
 0x2d7   : > { %s1781_s23 = smov 256   ;;  %s1782_s13 = smov 16  }
 0x2d8   : > { %1362 = dma.vmem_to_hbm [thread:$0]  (%p1978_p10), %s2189_s27, 4096, %s2187_s16, %s1111_s22, %s1781_s23, %s1781_s23, %s1782_s13  }
 0x2d9 PF: > { %s1140_s8 = sand.u32 1, %s1759_s18   ;;  %p2260_p12 = scmp.ne.s32.totalorder %s2247_s25, 0 }
 0x2da   : > { %p2261_p1 = scmp.ge.s32.totalorder %s1771_s21, 2  ;;  %s1141_s6 = scalar_lea.sflag [#allocation4], %s1140_s8 }
 0x2dc   : > { %p1382_p2 = pnand %p2261_p1, %p2260_p12 }
 0x2de   : > { %1754 = dma.done.wait (!%p1382_p2), %s1141_s6, 4096  }
 0x2df   : > { %1756 = vsyncadd (!%p1382_p2), %s1141_s6, 4294963200  ;;  %p20_p13 = scmp.ge.s32.totalorder %s1968_s14, 4   ;;  %s2262_s18 = smov %s1763_s19 }
 0x2e0   : > { %s2263_s19 = smov %s1767_s20  ;;  %s2264_s20 = smov %s1984_s7 }
 0x2e1   : > { %s2265_s21 = smov %s1968_s14  ;;  %22 = sbr.rel (!%p20_p13) target bundleno = 7 (0x7), region = 101 }
 0x2e8   :  { %1146 = vsyncpa [#allocation3], 1 }
 0x2e9   :  { %1148 = vsyncpa [#allocation3 + $0x1], 1 }
 0x2ea   :  { %1149 = vsyncpa [#allocation6], 1 }
 0x2eb   :  { %1150 = vsyncpa [#allocation9], 1 }
 0x2ec   :  { %1151 = vsyncpa [#allocation4], 1 }
 0x2ed   :  { %1153 = vsyncpa [#allocation4 + $0x1], 1 }

</bundles_post_ra>
